<compile_context>
chip_gen: v6e
topology: v6e:2x2x1
jax: 0.10.0
libtpu: 0.0.40
codegen_flags: <defaults>
</compile_context>

<pallas_src>
import functools
import math

import jax
import jax.numpy as jnp
from jax import lax
from jax.experimental import pallas as pl
from jax.experimental.pallas import tpu as pltpu


# ---------------------------------------------------------------------------
# Glue: projection of W onto { ||W||_inf <= kappa }  (per-row L1-ball projection)
# ---------------------------------------------------------------------------
def projection_norm_inf(W, kappa):
    def project_row(row):
        abs_r = jnp.abs(row)
        s = jnp.sum(abs_r)
        a = jnp.sort(abs_r)[::-1]                      # descending
        cssv = jnp.cumsum(a) - kappa
        ks = jnp.arange(1, row.shape[0] + 1, dtype=row.dtype)
        cond = (a - cssv / ks) > 0.0                   # monotone prefix of True
        rho = jnp.sum(cond.astype(jnp.int32))          # >= 1 when kappa > 0
        theta = cssv[rho - 1] / ks[rho - 1]
        projected = jnp.sign(row) * jnp.maximum(abs_r - theta, 0.0)
        return jnp.where(s > kappa, projected, row)

    return jax.vmap(project_row)(W)


# ---------------------------------------------------------------------------
# Pallas kernel: fused fixed-point iteration with early exit + f32 polish
# ---------------------------------------------------------------------------
def ignn_kernel(w_aug_ref, xu0_ref, a_ref, out_ref, *,
                m, n_blocks, polish_blocks, check_every,
                tol, lp_rtol, compute_dtype, use_lp):
    W_f32 = w_aug_ref[...]                 # (m, m+p) f32, W_aug = [W | Omega_1]
    A_f32 = a_ref[...]                     # (n, n)   f32
    XU0 = xu0_ref[...]                     # (m+p, n) f32, [X_0 ; U]
    X0 = XU0[:m, :]                        # (m, n) initial iterate
    U_f32 = XU0[m:, :]                     # (p, n) constant feature rows

    def make_step(Wmat, Amat, Urows):
        cd = Wmat.dtype

        def step(X):
            # X_new = relu([W | Omega_1] @ [X ; U] @ A) == relu(W@X@A + Omega_1@U@A)
            XU = jnp.concatenate([X.astype(cd), Urows], axis=0)
            T = jnp.dot(Wmat, XU, preferred_element_type=jnp.float32)
            S = jnp.dot(T.astype(cd), Amat, preferred_element_type=jnp.float32)
            return jnp.maximum(S, 0.0)

        return step

    def run_phase(X_init, Wmat, Amat, Urows, max_blocks, thr_fn):
        step = make_step(Wmat, Amat, Urows)

        def run_block(X):
            # check_every fixed-point steps, statically unrolled; convergence is
            # only checked on the last consecutive pair (reduce off the per-step
            # critical path).
            for _ in range(check_every - 1):
                X = step(X)
            Xn = step(X)
            err = jnp.max(jnp.abs(Xn - X))     # torch.norm(X_new - X, p=inf)
            return Xn, err

        def cond(carry):
            i, done, _ = carry
            return jnp.logical_and(i < max_blocks, done == 0)

        def body(carry):
            i, _, X = carry
            Xn, err = run_block(X)
            done = (err < thr_fn(Xn)).astype(jnp.int32)
            return i + jnp.int32(1), done, Xn

        _, _, Xf = lax.while_loop(cond, body,
                                  (jnp.int32(0), jnp.int32(0), X_init))
        return Xf

    X = X0

    # Phase 1: bf16 operands / f32 accumulation, relative early-exit threshold
    # (bf16 rounding noise sits far above tol=3e-6, so an absolute tol would
    # never fire and all iterations would run).
    if use_lp:
        W_lp = W_f32.astype(compute_dtype)
        A_lp = A_f32.astype(compute_dtype)
        U_lp = U_f32.astype(compute_dtype)

        def lp_thr(Xn):
            return jnp.maximum(jnp.float32(tol),
                               jnp.float32(lp_rtol) * jnp.max(jnp.abs(Xn)))

        X = run_phase(X, W_lp, A_lp, U_lp, n_blocks, lp_thr)

    # Phase 2: f32 polish (or the full run when compute_dtype == f32) at the
    # original tolerance.
    f32_blocks = polish_blocks if use_lp else n_blocks
    if f32_blocks > 0:
        X = run_phase(X, W_f32, A_f32, U_f32, f32_blocks,
                      lambda Xn: jnp.float32(tol))

    out_ref[...] = X.astype(out_ref.dtype)


def _vmem_limit_bytes(m, p, n, use_lp):
    """Generation-aware VMEM request: ~80% of physical with >= 8 MiB headroom."""
    try:
        cap = int(pltpu.get_tpu_info().vmem_capacity_bytes)
    except Exception:
        cap = 64 << 20                       # conservative (v7x-sized) fallback
    budget = min(cap - (8 << 20), int(cap * 0.8))
    mp = m + p
    est = (4 * m * mp + (2 * m * mp if use_lp else 0)   # W_aug (+ bf16 copy)
           + 4 * n * n + (2 * n * n if use_lp else 0)   # A     (+ bf16 copy)
           + 4 * mp * n * 2                              # XU_0, U rows
           + 4 * m * n * 6)                              # X carry, temps, out
    want = 2 * est + (4 << 20)
    return int(max(min(want, budget), min(32 << 20, budget)))


def implicit_graph_forward(W, Omega_1, X_0, A, U,
                           kappa=0.99, A_rho=1.0, fw_mitr=300, tol=3e-6,
                           check_every=8, compute_dtype=jnp.bfloat16,
                           lp_rtol=1e-2, polish_mitr=64):
    """Forward pass of ImplicitGraph with phi = ReLU (dense A, U)."""
    if kappa is not None:
        W = projection_norm_inf(W, kappa / A_rho)

    m, n = X_0.shape
    p = U.shape[0]

    # Fused operands built once in plain JAX: W_aug = [W | Omega_1], XU_0 = [X_0 ; U].
    W_aug = jnp.concatenate([W.astype(jnp.float32), Omega_1.astype(jnp.float32)],
                            axis=1)                       # (m, m+p)
    XU_0 = jnp.concatenate([X_0.astype(jnp.float32), U.astype(jnp.float32)],
                           axis=0)                        # (m+p, n)
    A = A.astype(jnp.float32)

    fw_mitr = int(fw_mitr)
    check_every = max(1, min(int(check_every), max(fw_mitr, 1)))
    cdiv = lambda a, b: -(-a // b)
    n_blocks = max(1, cdiv(fw_mitr, check_every))         # early exit makes the
    use_lp = jnp.dtype(compute_dtype) != jnp.dtype(jnp.float32)  # <= (check_every-1)
    polish_blocks = cdiv(int(polish_mitr), check_every) if use_lp else 0  # overshoot harmless

    kernel = functools.partial(
        ignn_kernel, m=m, n_blocks=n_blocks, polish_blocks=polish_blocks,
        check_every=check_every, tol=float(tol), lp_rtol=float(lp_rtol),
        compute_dtype=compute_dtype, use_lp=bool(use_lp))

    vmem_limit = _vmem_limit_bytes(m, p, n, bool(use_lp))

    flops_per_step = 2 * m * (m + p) * n + 2 * m * n * n
    total_steps = (n_blocks + polish_blocks) * check_every
    cost = pl.CostEstimate(
        flops=int(flops_per_step) * int(total_steps),
        transcendentals=0,
        bytes_accessed=int(4 * (m * (m + p) + (m + p) * n + n * n + m * n)))

    vmem = pl.BlockSpec(memory_space=pltpu.MemorySpace.VMEM)
    return pl.pallas_call(
        kernel,
        out_shape=jax.ShapeDtypeStruct((m, n), jnp.float32),
        in_specs=[vmem, vmem, vmem],
        out_specs=vmem,
        compiler_params=pltpu.CompilerParams(vmem_limit_bytes=vmem_limit),
        cost_estimate=cost,
    )(W_aug, XU_0, A)


# ---------------------------------------------------------------------------
# Pure-JAX f32 reference (torch-style per-step convergence check)
# ---------------------------------------------------------------------------
def reference_forward(W, Omega_1, X_0, A, U, kappa=0.99, A_rho=1.0,
                      fw_mitr=300, tol=3e-6):
    hp = lax.Precision.HIGHEST
    Wp = projection_norm_inf(W, kappa / A_rho) if kappa is not None else W
    B = jnp.dot(jnp.dot(Omega_1, U, precision=hp), A, precision=hp)

    def step(X):
        return jnp.maximum(
            jnp.dot(jnp.dot(Wp, X, precision=hp), A, precision=hp) + B, 0.0)

    def cond(c):
        i, err, _ = c
        return jnp.logical_and(i < fw_mitr, err >= tol)

    def body(c):
        i, _, X = c
        Xn = step(X)
        return i + 1, jnp.max(jnp.abs(Xn - X)), Xn

    _, _, Xf = lax.while_loop(cond, body,
                              (jnp.int32(0), jnp.float32(jnp.inf), X_0))
    return Xf


# ---------------------------------------------------------------------------
# Demo
# ---------------------------------------------------------------------------
if __name__ == "__main__":
    # Small demo shapes (in_features=p, out_features=m, num_node=n).
    # For real workloads pad n to a multiple of 256 (v6e/v7x MXU) and batch
    # along m to fill the systolic array.
    p, m, n = 16, 32, 128
    kappa = 0.99

    key = jax.random.PRNGKey(0)
    k_w, k_o1, k_o2, k_b, k_u, k_a = jax.random.split(key, 6)

    # Deterministic parameter init mirroring Module.init(): U(-stdv, stdv), stdv = 1/sqrt(m)
    stdv = 1.0 / math.sqrt(m)
    W = jax.random.uniform(k_w, (m, m), jnp.float32, -stdv, stdv)
    Omega_1 = jax.random.uniform(k_o1, (m, p), jnp.float32, -stdv, stdv)
    Omega_2 = jax.random.uniform(k_o2, (m, p), jnp.float32, -stdv, stdv)  # unused in forward
    bias = jax.random.uniform(k_b, (m, 1), jnp.float32, -stdv, stdv)      # unused in forward

    # Inputs: features U (p, n), initial state X_0 (m, n), column-normalized adjacency A (n, n)
    U = jax.random.uniform(k_u, (p, n), jnp.float32, -1.0, 1.0)
    X_0 = jnp.zeros((m, n), jnp.float32)
    adj = (jax.random.uniform(k_a, (n, n)) < 0.05).astype(jnp.float32) + jnp.eye(n, dtype=jnp.float32)
    A = adj / jnp.sum(adj, axis=0, keepdims=True)   # ||A||_1 = 1 -> contraction with kappa < 1

    out = implicit_graph_forward(W, Omega_1, X_0, A, U,
                                 kappa=kappa, A_rho=1.0, fw_mitr=300, tol=3e-6,
                                 check_every=8, compute_dtype=jnp.bfloat16,
                                 lp_rtol=1e-2, polish_mitr=64)
    out = jax.block_until_ready(out)

    assert out.shape == (m, n) and out.dtype == jnp.float32
    assert bool(jnp.all(jnp.isfinite(out)))

    ref = jax.block_until_ready(
        reference_forward(W, Omega_1, X_0, A, U,
                          kappa=kappa, A_rho=1.0, fw_mitr=300, tol=3e-6))
    max_diff = float(jnp.max(jnp.abs(out - ref)))
    assert max_diff < 1e-2, f"kernel/reference mismatch: {max_diff}"

    print("KERNEL_OK")
</pallas_src>

<mosaic_0001>
module attributes {stable_mosaic.version = 11 : i64} {
  func.func @ignn_kernel(%arg0: memref<32x48xf32, #tpu.memory_space<vmem>>, %arg1: memref<48x128xf32, #tpu.memory_space<vmem>>, %arg2: memref<128x128xf32, #tpu.memory_space<vmem>>, %arg3: memref<32x128xf32, #tpu.memory_space<vmem>>) attributes {dimension_semantics = [], scalar_prefetch = 0 : i64, scratch_operands = 0 : i64, tpu.core_type = #tpu.core_type<tc>} {
    %c0 = arith.constant 0 : index
    %c0_0 = arith.constant 0 : index
    %0 = vector.load %arg0[%c0, %c0_0] : memref<32x48xf32, #tpu.memory_space<vmem>>, vector<32x48xf32>
    %c0_1 = arith.constant 0 : index
    %c0_2 = arith.constant 0 : index
    %1 = vector.load %arg2[%c0_1, %c0_2] : memref<128x128xf32, #tpu.memory_space<vmem>>, vector<128x128xf32>
    %c0_3 = arith.constant 0 : index
    %c0_4 = arith.constant 0 : index
    %2 = vector.load %arg1[%c0_3, %c0_4] : memref<48x128xf32, #tpu.memory_space<vmem>>, vector<48x128xf32>
    %3 = vector.extract_strided_slice %2 {offsets = [0, 0], sizes = [32, 128], strides = [1, 1]} : vector<48x128xf32> to vector<32x128xf32>
    %4 = vector.extract_strided_slice %2 {offsets = [32, 0], sizes = [16, 128], strides = [1, 1]} : vector<48x128xf32> to vector<16x128xf32>
    %5 = arith.truncf %0 : vector<32x48xf32> to vector<32x48xbf16>
    %6 = arith.truncf %1 : vector<128x128xf32> to vector<128x128xbf16>
    %7 = arith.truncf %4 : vector<16x128xf32> to vector<16x128xbf16>
    %c0_i32 = arith.constant 0 : i32
    %c0_i32_5 = arith.constant 0 : i32
    %8:3 = scf.while (%arg4 = %c0_i32, %arg5 = %c0_i32_5, %arg6 = %3) : (i32, i32, vector<32x128xf32>) -> (i32, i32, vector<32x128xf32>) {
      %c38_i32 = arith.constant 38 : i32
      %11 = arith.cmpi slt, %arg4, %c38_i32 : i32
      %c0_i32_10 = arith.constant 0 : i32
      %12 = arith.cmpi eq, %arg5, %c0_i32_10 : i32
      %13 = arith.andi %11, %12 : i1
      scf.condition(%13) %arg4, %arg5, %arg6 : i32, i32, vector<32x128xf32>
    } do {
    ^bb0(%arg4: i32, %arg5: i32, %arg6: vector<32x128xf32>):
      %11 = arith.truncf %arg6 : vector<32x128xf32> to vector<32x128xbf16>
      %12 = tpu.concatenate %11, %7 in 0 : vector<32x128xbf16>, vector<16x128xbf16> -> vector<48x128xbf16>
      %cst = arith.constant dense<0.000000e+00> : vector<32x128xf32>
      %13 = tpu.matmul %5, %12, %cst {dimension_numbers = #tpu.dot_dimension_numbers<[1], [0], [0], [1], [0, 0, 1, 1], [], []>} : vector<32x48xbf16>, vector<48x128xbf16>, vector<32x128xf32> -> vector<32x128xf32>
      %14 = arith.truncf %13 : vector<32x128xf32> to vector<32x128xbf16>
      %cst_10 = arith.constant dense<0.000000e+00> : vector<32x128xf32>
      %15 = tpu.matmul %14, %6, %cst_10 {dimension_numbers = #tpu.dot_dimension_numbers<[1], [0], [0], [1], [0, 0, 1, 1], [], []>} : vector<32x128xbf16>, vector<128x128xbf16>, vector<32x128xf32> -> vector<32x128xf32>
      %cst_11 = arith.constant 0.000000e+00 : f32
      %16 = vector.broadcast %cst_11 : f32 to vector<32x128xf32>
      %17 = arith.maximumf %15, %16 : vector<32x128xf32>
      %18 = arith.truncf %17 : vector<32x128xf32> to vector<32x128xbf16>
      %19 = tpu.concatenate %18, %7 in 0 : vector<32x128xbf16>, vector<16x128xbf16> -> vector<48x128xbf16>
      %cst_12 = arith.constant dense<0.000000e+00> : vector<32x128xf32>
      %20 = tpu.matmul %5, %19, %cst_12 {dimension_numbers = #tpu.dot_dimension_numbers<[1], [0], [0], [1], [0, 0, 1, 1], [], []>} : vector<32x48xbf16>, vector<48x128xbf16>, vector<32x128xf32> -> vector<32x128xf32>
      %21 = arith.truncf %20 : vector<32x128xf32> to vector<32x128xbf16>
      %cst_13 = arith.constant dense<0.000000e+00> : vector<32x128xf32>
      %22 = tpu.matmul %21, %6, %cst_13 {dimension_numbers = #tpu.dot_dimension_numbers<[1], [0], [0], [1], [0, 0, 1, 1], [], []>} : vector<32x128xbf16>, vector<128x128xbf16>, vector<32x128xf32> -> vector<32x128xf32>
      %cst_14 = arith.constant 0.000000e+00 : f32
      %23 = vector.broadcast %cst_14 : f32 to vector<32x128xf32>
      %24 = arith.maximumf %22, %23 : vector<32x128xf32>
      %25 = arith.truncf %24 : vector<32x128xf32> to vector<32x128xbf16>
      %26 = tpu.concatenate %25, %7 in 0 : vector<32x128xbf16>, vector<16x128xbf16> -> vector<48x128xbf16>
      %cst_15 = arith.constant dense<0.000000e+00> : vector<32x128xf32>
      %27 = tpu.matmul %5, %26, %cst_15 {dimension_numbers = #tpu.dot_dimension_numbers<[1], [0], [0], [1], [0, 0, 1, 1], [], []>} : vector<32x48xbf16>, vector<48x128xbf16>, vector<32x128xf32> -> vector<32x128xf32>
      %28 = arith.truncf %27 : vector<32x128xf32> to vector<32x128xbf16>
      %cst_16 = arith.constant dense<0.000000e+00> : vector<32x128xf32>
      %29 = tpu.matmul %28, %6, %cst_16 {dimension_numbers = #tpu.dot_dimension_numbers<[1], [0], [0], [1], [0, 0, 1, 1], [], []>} : vector<32x128xbf16>, vector<128x128xbf16>, vector<32x128xf32> -> vector<32x128xf32>
      %cst_17 = arith.constant 0.000000e+00 : f32
      %30 = vector.broadcast %cst_17 : f32 to vector<32x128xf32>
      %31 = arith.maximumf %29, %30 : vector<32x128xf32>
      %32 = arith.truncf %31 : vector<32x128xf32> to vector<32x128xbf16>
      %33 = tpu.concatenate %32, %7 in 0 : vector<32x128xbf16>, vector<16x128xbf16> -> vector<48x128xbf16>
      %cst_18 = arith.constant dense<0.000000e+00> : vector<32x128xf32>
      %34 = tpu.matmul %5, %33, %cst_18 {dimension_numbers = #tpu.dot_dimension_numbers<[1], [0], [0], [1], [0, 0, 1, 1], [], []>} : vector<32x48xbf16>, vector<48x128xbf16>, vector<32x128xf32> -> vector<32x128xf32>
      %35 = arith.truncf %34 : vector<32x128xf32> to vector<32x128xbf16>
      %cst_19 = arith.constant dense<0.000000e+00> : vector<32x128xf32>
      %36 = tpu.matmul %35, %6, %cst_19 {dimension_numbers = #tpu.dot_dimension_numbers<[1], [0], [0], [1], [0, 0, 1, 1], [], []>} : vector<32x128xbf16>, vector<128x128xbf16>, vector<32x128xf32> -> vector<32x128xf32>
      %cst_20 = arith.constant 0.000000e+00 : f32
      %37 = vector.broadcast %cst_20 : f32 to vector<32x128xf32>
      %38 = arith.maximumf %36, %37 : vector<32x128xf32>
      %39 = arith.truncf %38 : vector<32x128xf32> to vector<32x128xbf16>
      %40 = tpu.concatenate %39, %7 in 0 : vector<32x128xbf16>, vector<16x128xbf16> -> vector<48x128xbf16>
      %cst_21 = arith.constant dense<0.000000e+00> : vector<32x128xf32>
      %41 = tpu.matmul %5, %40, %cst_21 {dimension_numbers = #tpu.dot_dimension_numbers<[1], [0], [0], [1], [0, 0, 1, 1], [], []>} : vector<32x48xbf16>, vector<48x128xbf16>, vector<32x128xf32> -> vector<32x128xf32>
      %42 = arith.truncf %41 : vector<32x128xf32> to vector<32x128xbf16>
      %cst_22 = arith.constant dense<0.000000e+00> : vector<32x128xf32>
      %43 = tpu.matmul %42, %6, %cst_22 {dimension_numbers = #tpu.dot_dimension_numbers<[1], [0], [0], [1], [0, 0, 1, 1], [], []>} : vector<32x128xbf16>, vector<128x128xbf16>, vector<32x128xf32> -> vector<32x128xf32>
      %cst_23 = arith.constant 0.000000e+00 : f32
      %44 = vector.broadcast %cst_23 : f32 to vector<32x128xf32>
      %45 = arith.maximumf %43, %44 : vector<32x128xf32>
      %46 = arith.truncf %45 : vector<32x128xf32> to vector<32x128xbf16>
      %47 = tpu.concatenate %46, %7 in 0 : vector<32x128xbf16>, vector<16x128xbf16> -> vector<48x128xbf16>
      %cst_24 = arith.constant dense<0.000000e+00> : vector<32x128xf32>
      %48 = tpu.matmul %5, %47, %cst_24 {dimension_numbers = #tpu.dot_dimension_numbers<[1], [0], [0], [1], [0, 0, 1, 1], [], []>} : vector<32x48xbf16>, vector<48x128xbf16>, vector<32x128xf32> -> vector<32x128xf32>
      %49 = arith.truncf %48 : vector<32x128xf32> to vector<32x128xbf16>
      %cst_25 = arith.constant dense<0.000000e+00> : vector<32x128xf32>
      %50 = tpu.matmul %49, %6, %cst_25 {dimension_numbers = #tpu.dot_dimension_numbers<[1], [0], [0], [1], [0, 0, 1, 1], [], []>} : vector<32x128xbf16>, vector<128x128xbf16>, vector<32x128xf32> -> vector<32x128xf32>
      %cst_26 = arith.constant 0.000000e+00 : f32
      %51 = vector.broadcast %cst_26 : f32 to vector<32x128xf32>
      %52 = arith.maximumf %50, %51 : vector<32x128xf32>
      %53 = arith.truncf %52 : vector<32x128xf32> to vector<32x128xbf16>
      %54 = tpu.concatenate %53, %7 in 0 : vector<32x128xbf16>, vector<16x128xbf16> -> vector<48x128xbf16>
      %cst_27 = arith.constant dense<0.000000e+00> : vector<32x128xf32>
      %55 = tpu.matmul %5, %54, %cst_27 {dimension_numbers = #tpu.dot_dimension_numbers<[1], [0], [0], [1], [0, 0, 1, 1], [], []>} : vector<32x48xbf16>, vector<48x128xbf16>, vector<32x128xf32> -> vector<32x128xf32>
      %56 = arith.truncf %55 : vector<32x128xf32> to vector<32x128xbf16>
      %cst_28 = arith.constant dense<0.000000e+00> : vector<32x128xf32>
      %57 = tpu.matmul %56, %6, %cst_28 {dimension_numbers = #tpu.dot_dimension_numbers<[1], [0], [0], [1], [0, 0, 1, 1], [], []>} : vector<32x128xbf16>, vector<128x128xbf16>, vector<32x128xf32> -> vector<32x128xf32>
      %cst_29 = arith.constant 0.000000e+00 : f32
      %58 = vector.broadcast %cst_29 : f32 to vector<32x128xf32>
      %59 = arith.maximumf %57, %58 : vector<32x128xf32>
      %60 = arith.truncf %59 : vector<32x128xf32> to vector<32x128xbf16>
      %61 = tpu.concatenate %60, %7 in 0 : vector<32x128xbf16>, vector<16x128xbf16> -> vector<48x128xbf16>
      %cst_30 = arith.constant dense<0.000000e+00> : vector<32x128xf32>
      %62 = tpu.matmul %5, %61, %cst_30 {dimension_numbers = #tpu.dot_dimension_numbers<[1], [0], [0], [1], [0, 0, 1, 1], [], []>} : vector<32x48xbf16>, vector<48x128xbf16>, vector<32x128xf32> -> vector<32x128xf32>
      %63 = arith.truncf %62 : vector<32x128xf32> to vector<32x128xbf16>
      %cst_31 = arith.constant dense<0.000000e+00> : vector<32x128xf32>
      %64 = tpu.matmul %63, %6, %cst_31 {dimension_numbers = #tpu.dot_dimension_numbers<[1], [0], [0], [1], [0, 0, 1, 1], [], []>} : vector<32x128xbf16>, vector<128x128xbf16>, vector<32x128xf32> -> vector<32x128xf32>
      %cst_32 = arith.constant 0.000000e+00 : f32
      %65 = vector.broadcast %cst_32 : f32 to vector<32x128xf32>
      %66 = arith.maximumf %64, %65 : vector<32x128xf32>
      %67 = arith.subf %66, %59 : vector<32x128xf32>
      %68 = math.absf %67 : vector<32x128xf32>
      %69 = vector.shape_cast %68 : vector<32x128xf32> to vector<1x32x128xf32>
      %cst_33 = arith.constant dense<0xFF800000> : vector<1xf32>
      %70 = vector.multi_reduction <maximumf>, %69, %cst_33 [1, 2] : vector<1x32x128xf32> to vector<1xf32>
      %71 = vector.shape_cast %70 : vector<1xf32> to vector<1x1x1xf32>
      %72 = vector.extract %71[0, 0, 0] : f32 from vector<1x1x1xf32>
      %73 = math.absf %66 : vector<32x128xf32>
      %74 = vector.shape_cast %73 : vector<32x128xf32> to vector<1x32x128xf32>
      %cst_34 = arith.constant dense<0xFF800000> : vector<1xf32>
      %75 = vector.multi_reduction <maximumf>, %74, %cst_34 [1, 2] : vector<1x32x128xf32> to vector<1xf32>
      %76 = vector.shape_cast %75 : vector<1xf32> to vector<1x1x1xf32>
      %77 = vector.extract %76[0, 0, 0] : f32 from vector<1x1x1xf32>
      %cst_35 = arith.constant 0.00999999977 : f32
      %78 = arith.mulf %cst_35, %77 : f32
      %cst_36 = arith.constant 3.000000e-06 : f32
      %79 = arith.maximumf %cst_36, %78 : f32
      %80 = arith.cmpf olt, %72, %79 : f32
      %81 = arith.extui %80 : i1 to i32
      %c1_i32 = arith.constant 1 : i32
      %82 = arith.addi %arg4, %c1_i32 : i32
      scf.yield %82, %81, %66 : i32, i32, vector<32x128xf32>
    }
    %c0_i32_6 = arith.constant 0 : i32
    %c0_i32_7 = arith.constant 0 : i32
    %9:3 = scf.while (%arg4 = %c0_i32_6, %arg5 = %c0_i32_7, %arg6 = %8#2) : (i32, i32, vector<32x128xf32>) -> (i32, i32, vector<32x128xf32>) {
      %c8_i32 = arith.constant 8 : i32
      %11 = arith.cmpi slt, %arg4, %c8_i32 : i32
      %c0_i32_10 = arith.constant 0 : i32
      %12 = arith.cmpi eq, %arg5, %c0_i32_10 : i32
      %13 = arith.andi %11, %12 : i1
      scf.condition(%13) %arg4, %arg5, %arg6 : i32, i32, vector<32x128xf32>
    } do {
    ^bb0(%arg4: i32, %arg5: i32, %arg6: vector<32x128xf32>):
      %11 = tpu.concatenate %arg6, %4 in 0 : vector<32x128xf32>, vector<16x128xf32> -> vector<48x128xf32>
      %cst = arith.constant dense<0.000000e+00> : vector<32x128xf32>
      %12 = tpu.matmul %0, %11, %cst {dimension_numbers = #tpu.dot_dimension_numbers<[1], [0], [0], [1], [0, 0, 1, 1], [], []>} : vector<32x48xf32>, vector<48x128xf32>, vector<32x128xf32> -> vector<32x128xf32>
      %cst_10 = arith.constant dense<0.000000e+00> : vector<32x128xf32>
      %13 = tpu.matmul %12, %1, %cst_10 {dimension_numbers = #tpu.dot_dimension_numbers<[1], [0], [0], [1], [0, 0, 1, 1], [], []>} : vector<32x128xf32>, vector<128x128xf32>, vector<32x128xf32> -> vector<32x128xf32>
      %cst_11 = arith.constant 0.000000e+00 : f32
      %14 = vector.broadcast %cst_11 : f32 to vector<32x128xf32>
      %15 = arith.maximumf %13, %14 : vector<32x128xf32>
      %16 = tpu.concatenate %15, %4 in 0 : vector<32x128xf32>, vector<16x128xf32> -> vector<48x128xf32>
      %cst_12 = arith.constant dense<0.000000e+00> : vector<32x128xf32>
      %17 = tpu.matmul %0, %16, %cst_12 {dimension_numbers = #tpu.dot_dimension_numbers<[1], [0], [0], [1], [0, 0, 1, 1], [], []>} : vector<32x48xf32>, vector<48x128xf32>, vector<32x128xf32> -> vector<32x128xf32>
      %cst_13 = arith.constant dense<0.000000e+00> : vector<32x128xf32>
      %18 = tpu.matmul %17, %1, %cst_13 {dimension_numbers = #tpu.dot_dimension_numbers<[1], [0], [0], [1], [0, 0, 1, 1], [], []>} : vector<32x128xf32>, vector<128x128xf32>, vector<32x128xf32> -> vector<32x128xf32>
      %cst_14 = arith.constant 0.000000e+00 : f32
      %19 = vector.broadcast %cst_14 : f32 to vector<32x128xf32>
      %20 = arith.maximumf %18, %19 : vector<32x128xf32>
      %21 = tpu.concatenate %20, %4 in 0 : vector<32x128xf32>, vector<16x128xf32> -> vector<48x128xf32>
      %cst_15 = arith.constant dense<0.000000e+00> : vector<32x128xf32>
      %22 = tpu.matmul %0, %21, %cst_15 {dimension_numbers = #tpu.dot_dimension_numbers<[1], [0], [0], [1], [0, 0, 1, 1], [], []>} : vector<32x48xf32>, vector<48x128xf32>, vector<32x128xf32> -> vector<32x128xf32>
      %cst_16 = arith.constant dense<0.000000e+00> : vector<32x128xf32>
      %23 = tpu.matmul %22, %1, %cst_16 {dimension_numbers = #tpu.dot_dimension_numbers<[1], [0], [0], [1], [0, 0, 1, 1], [], []>} : vector<32x128xf32>, vector<128x128xf32>, vector<32x128xf32> -> vector<32x128xf32>
      %cst_17 = arith.constant 0.000000e+00 : f32
      %24 = vector.broadcast %cst_17 : f32 to vector<32x128xf32>
      %25 = arith.maximumf %23, %24 : vector<32x128xf32>
      %26 = tpu.concatenate %25, %4 in 0 : vector<32x128xf32>, vector<16x128xf32> -> vector<48x128xf32>
      %cst_18 = arith.constant dense<0.000000e+00> : vector<32x128xf32>
      %27 = tpu.matmul %0, %26, %cst_18 {dimension_numbers = #tpu.dot_dimension_numbers<[1], [0], [0], [1], [0, 0, 1, 1], [], []>} : vector<32x48xf32>, vector<48x128xf32>, vector<32x128xf32> -> vector<32x128xf32>
      %cst_19 = arith.constant dense<0.000000e+00> : vector<32x128xf32>
      %28 = tpu.matmul %27, %1, %cst_19 {dimension_numbers = #tpu.dot_dimension_numbers<[1], [0], [0], [1], [0, 0, 1, 1], [], []>} : vector<32x128xf32>, vector<128x128xf32>, vector<32x128xf32> -> vector<32x128xf32>
      %cst_20 = arith.constant 0.000000e+00 : f32
      %29 = vector.broadcast %cst_20 : f32 to vector<32x128xf32>
      %30 = arith.maximumf %28, %29 : vector<32x128xf32>
      %31 = tpu.concatenate %30, %4 in 0 : vector<32x128xf32>, vector<16x128xf32> -> vector<48x128xf32>
      %cst_21 = arith.constant dense<0.000000e+00> : vector<32x128xf32>
      %32 = tpu.matmul %0, %31, %cst_21 {dimension_numbers = #tpu.dot_dimension_numbers<[1], [0], [0], [1], [0, 0, 1, 1], [], []>} : vector<32x48xf32>, vector<48x128xf32>, vector<32x128xf32> -> vector<32x128xf32>
      %cst_22 = arith.constant dense<0.000000e+00> : vector<32x128xf32>
      %33 = tpu.matmul %32, %1, %cst_22 {dimension_numbers = #tpu.dot_dimension_numbers<[1], [0], [0], [1], [0, 0, 1, 1], [], []>} : vector<32x128xf32>, vector<128x128xf32>, vector<32x128xf32> -> vector<32x128xf32>
      %cst_23 = arith.constant 0.000000e+00 : f32
      %34 = vector.broadcast %cst_23 : f32 to vector<32x128xf32>
      %35 = arith.maximumf %33, %34 : vector<32x128xf32>
      %36 = tpu.concatenate %35, %4 in 0 : vector<32x128xf32>, vector<16x128xf32> -> vector<48x128xf32>
      %cst_24 = arith.constant dense<0.000000e+00> : vector<32x128xf32>
      %37 = tpu.matmul %0, %36, %cst_24 {dimension_numbers = #tpu.dot_dimension_numbers<[1], [0], [0], [1], [0, 0, 1, 1], [], []>} : vector<32x48xf32>, vector<48x128xf32>, vector<32x128xf32> -> vector<32x128xf32>
      %cst_25 = arith.constant dense<0.000000e+00> : vector<32x128xf32>
      %38 = tpu.matmul %37, %1, %cst_25 {dimension_numbers = #tpu.dot_dimension_numbers<[1], [0], [0], [1], [0, 0, 1, 1], [], []>} : vector<32x128xf32>, vector<128x128xf32>, vector<32x128xf32> -> vector<32x128xf32>
      %cst_26 = arith.constant 0.000000e+00 : f32
      %39 = vector.broadcast %cst_26 : f32 to vector<32x128xf32>
      %40 = arith.maximumf %38, %39 : vector<32x128xf32>
      %41 = tpu.concatenate %40, %4 in 0 : vector<32x128xf32>, vector<16x128xf32> -> vector<48x128xf32>
      %cst_27 = arith.constant dense<0.000000e+00> : vector<32x128xf32>
      %42 = tpu.matmul %0, %41, %cst_27 {dimension_numbers = #tpu.dot_dimension_numbers<[1], [0], [0], [1], [0, 0, 1, 1], [], []>} : vector<32x48xf32>, vector<48x128xf32>, vector<32x128xf32> -> vector<32x128xf32>
      %cst_28 = arith.constant dense<0.000000e+00> : vector<32x128xf32>
      %43 = tpu.matmul %42, %1, %cst_28 {dimension_numbers = #tpu.dot_dimension_numbers<[1], [0], [0], [1], [0, 0, 1, 1], [], []>} : vector<32x128xf32>, vector<128x128xf32>, vector<32x128xf32> -> vector<32x128xf32>
      %cst_29 = arith.constant 0.000000e+00 : f32
      %44 = vector.broadcast %cst_29 : f32 to vector<32x128xf32>
      %45 = arith.maximumf %43, %44 : vector<32x128xf32>
      %46 = tpu.concatenate %45, %4 in 0 : vector<32x128xf32>, vector<16x128xf32> -> vector<48x128xf32>
      %cst_30 = arith.constant dense<0.000000e+00> : vector<32x128xf32>
      %47 = tpu.matmul %0, %46, %cst_30 {dimension_numbers = #tpu.dot_dimension_numbers<[1], [0], [0], [1], [0, 0, 1, 1], [], []>} : vector<32x48xf32>, vector<48x128xf32>, vector<32x128xf32> -> vector<32x128xf32>
      %cst_31 = arith.constant dense<0.000000e+00> : vector<32x128xf32>
      %48 = tpu.matmul %47, %1, %cst_31 {dimension_numbers = #tpu.dot_dimension_numbers<[1], [0], [0], [1], [0, 0, 1, 1], [], []>} : vector<32x128xf32>, vector<128x128xf32>, vector<32x128xf32> -> vector<32x128xf32>
      %cst_32 = arith.constant 0.000000e+00 : f32
      %49 = vector.broadcast %cst_32 : f32 to vector<32x128xf32>
      %50 = arith.maximumf %48, %49 : vector<32x128xf32>
      %51 = arith.subf %50, %45 : vector<32x128xf32>
      %52 = math.absf %51 : vector<32x128xf32>
      %53 = vector.shape_cast %52 : vector<32x128xf32> to vector<1x32x128xf32>
      %cst_33 = arith.constant dense<0xFF800000> : vector<1xf32>
      %54 = vector.multi_reduction <maximumf>, %53, %cst_33 [1, 2] : vector<1x32x128xf32> to vector<1xf32>
      %55 = vector.shape_cast %54 : vector<1xf32> to vector<1x1x1xf32>
      %56 = vector.extract %55[0, 0, 0] : f32 from vector<1x1x1xf32>
      %cst_34 = arith.constant 3.000000e-06 : f32
      %57 = arith.cmpf olt, %56, %cst_34 : f32
      %58 = arith.extui %57 : i1 to i32
      %c1_i32 = arith.constant 1 : i32
      %59 = arith.addi %arg4, %c1_i32 : i32
      scf.yield %59, %58, %50 : i32, i32, vector<32x128xf32>
    }
    %c0_8 = arith.constant 0 : index
    %c0_9 = arith.constant 0 : index
    %10 = vector.load %arg3[%c0_8, %c0_9] : memref<32x128xf32, #tpu.memory_space<vmem>>, vector<32x128xf32>
    tpu.vector_store %arg3[%c0_8, %c0_9], %9#2 {strides = array<i32>} : memref<32x128xf32, #tpu.memory_space<vmem>>, vector<32x128xf32>,
    return
  }
}

</mosaic_0001>

<bundles_post_ra>
// kernel: tpu_custom_call.1
= control target key start
LH: loop header
LB: loop body
LE: loop exit
PB: predicated region body
PF: predicated region fallthrough
CT: control target
= control target key end

     0   :  { %8 = vsyncpa [#allocation3], 0  ;;  %s4603_s0 = inlined_call_operand.hbm [shape: f32[32,48], index: 0, kind: input, shape index: {}]   ;;  %s4604_s1 = inlined_call_operand.hbm [shape: f32[48,128], index: 1, kind: input, shape index: {}]   ;;  %s4605_s2 = inlined_call_operand.hbm [shape: f32[128,128], index: 2, kind: input, shape index: {}]   ;;  %s4606_s3 = inlined_call_operand.hbm [shape: f32[32,128], index: 3, kind: output, shape index: {}]  }
   0x1   :  { %9 = vsyncpa [#allocation6], 0 }
   0x2   :  { %10 = vsyncpa [#allocation4], 0  ;;  %s3861_s12 = smov [#allocation5]   ;;  %s3862_s14 = smov [#allocation2]  }
   0x3   :  { %s28_s13 = sshll.u32 %s3861_s12, 4  ;;  %s16_s15 = sshll.u32 %s3862_s14, 4  ;;  %s29_s13 = int_to_ptr.vmem [resolvable:$true] %s28_s13  ;;  %s17_s15 = int_to_ptr.vmem [resolvable:$true] %s16_s15 }
   0x4   :  { %s3703_s16 = scalar_lea.vmem %s29_s13, 768  ;;  %p3708_p1 = scmp.lt.s32.totalorder %s29_s13, %s29_s13 }
   0x5   :  { %p3704_p0 = scmp.ne.s32.totalorder %s29_s13, %s3703_s16  ;;  %p3709_p2 = scmp.lt.s32.totalorder %s3703_s16, %s3703_s16 }
   0x7   :  { %p3710_p3 = por %p3709_p2, %p3708_p1 }
   0x9   :  { %p3711_p4 = pnand %p3710_p3, %p3704_p0 }
   0xb   :  { %3714 = shalt.err (!%p3711_p4)
}
   0xc   :  { %s3863_s17 = smov 128   ;;  %s3864_s18 = smov 8  }
   0xd   :  { %34 = dma.hbm_to_vmem [thread:$0]  %s4604_s1, 768, %s29_s13, [#allocation6], %s3863_s17, %s3863_s17, %s3864_s18  }
   0xe   :  { %s3723_s21 = scalar_lea.vmem %s17_s15, 512  ;;  %p3728_p6 = scmp.lt.s32.totalorder %s17_s15, %s17_s15 }
   0xf   :  { %p3724_p5 = scmp.ne.s32.totalorder %s17_s15, %s3723_s21  ;;  %p3729_p7 = scmp.lt.s32.totalorder %s3723_s21, %s3723_s21 }
  0x11   :  { %p3730_p8 = por %p3729_p7, %p3728_p6 }
  0x13   :  { %p3731_p9 = pnand %p3730_p8, %p3724_p5 }
  0x15   :  { %3734 = shalt.err (!%p3731_p9)
}
  0x16   :  { %22 = dma.hbm_to_vmem [thread:$0]  %s4603_s0, 512, %s17_s15, [#allocation3], %s3863_s17, %s3863_s17, %s3864_s18  }
  0x17   :  { %s3865_s24 = smov [#allocation7]  }
  0x18   :  { %s40_s25 = sshll.u32 %s3865_s24, 4  ;;  %s41_s25 = int_to_ptr.vmem [resolvable:$true] %s40_s25 }
  0x19   :  { %s3743_s26 = scalar_lea.vmem %s41_s25, 2048  ;;  %p3748_p11 = scmp.lt.s32.totalorder %s41_s25, %s41_s25 }
  0x1a   :  { %p3744_p10 = scmp.ne.s32.totalorder %s41_s25, %s3743_s26  ;;  %p3749_p12 = scmp.lt.s32.totalorder %s3743_s26, %s3743_s26 }
  0x1c   :  { %p3750_p13 = por %p3749_p12, %p3748_p11 }
  0x1e   :  { %p3751_p0 = pnand %p3750_p13, %p3744_p10 }
  0x20   :  { %3754 = shalt.err (!%p3751_p0)
}
  0x21   :  { %46 = dma.hbm_to_vmem [thread:$0]  %s4605_s2, 2048, %s41_s25, [#allocation6], %s3863_s17, %s3863_s17, %s3864_s18  }
  0x22   :  { %3815 = dma.done.wait [#allocation3], 512  }
  0x23   :  { %3816 = vsyncadd [#allocation3], 4294966784 }
  0x24   :  { %3817 = dma.done.wait [#allocation6], 2816  }
  0x25   :  { %3818 = vsyncadd [#allocation6], 4294964480  ;;  %v3906_v0 = vld [vmem:[#allocation2] sm:$0xff]  ;;  %v3908_v1 = vld [vmem:[#allocation2 + $0x8] sm:$0xff]  ;;  %s4002_s0 = smov 0  }
  0x26   :  { %v3910_v2 = vld [vmem:[#allocation2 + $0x10] sm:$0xff]  ;;  %v3912_v3 = vld [vmem:[#allocation2 + $0x18] sm:$0xff]  ;;  %v3920_v6 = vpack.c.bf16 %v3908_v1, %v3906_v0  ;;  %v3922_v7 = vld [vmem:[#allocation7 + $0x10] sm:$0xff] }
  0x27   :  { %v3914_v4 = vld [vmem:[#allocation7] sm:$0xff]  ;;  %v3916_v5 = vld [vmem:[#allocation7 + $0x8] sm:$0xff]  ;;  %v3924_v8 = vld [vmem:[#allocation7 + $0x18] sm:$0xff]  ;;  %v3930_v10 = vpack.c.bf16 %v3912_v3, %v3910_v2 }
  0x28   :  { %v3926_v9 = vld [vmem:[#allocation7 + $0x20] sm:$0xff]  ;;  %v3934_v11 = vpack.c.bf16 %v3916_v5, %v3914_v4  ;;  %v3936_v12 = vld [vmem:[#allocation7 + $0x28] sm:$0xff]  ;;  %v3938_v13 = vld [vmem:[#allocation7 + $0x30] sm:$0xff]  ;;  %v3944_v15 = vpack.c.bf16 %v3924_v8, %v3922_v7 }
  0x29   :  { %v3940_v14 = vld [vmem:[#allocation7 + $0x38] sm:$0xff]  ;;  %v3946_v16 = vld [vmem:[#allocation7 + $0x40] sm:$0xff]  ;;  %v3948_v17 = vld [vmem:[#allocation7 + $0x48] sm:$0xff]  ;;  %v3954_v19 = vpack.c.bf16 %v3936_v12, %v3926_v9 }
  0x2a   :  { %v3950_v18 = vld [vmem:[#allocation7 + $0x50] sm:$0xff]  ;;  %v3958_v20 = vpack.c.bf16 %v3940_v14, %v3938_v13  ;;  %v3960_v21 = vld [vmem:[#allocation7 + $0x58] sm:$0xff]  ;;  %v3962_v22 = vld [vmem:[#allocation7 + $0x60] sm:$0xff]  ;;  %v3968_v24 = vpack.c.bf16 %v3948_v17, %v3946_v16 }
  0x2b   :  { %v3964_v23 = vld [vmem:[#allocation7 + $0x68] sm:$0xff]  ;;  %v3970_v25 = vld [vmem:[#allocation7 + $0x70] sm:$0xff]  ;;  %v3972_v26 = vld [vmem:[#allocation7 + $0x78] sm:$0xff]  ;;  %v3976_v28 = vpack.c.bf16 %v3960_v21, %v3950_v18 }
  0x2c   :  { %v77_v27 = vld [vmem:[#allocation5] sm:$0xff]   ;;  %v3980_v29 = vpack.c.bf16 %v3964_v23, %v3962_v22  ;;  %v78_v30 = vld [vmem:[#allocation5 + $0x8] sm:$0xff]   ;;  %v79_v31 = vld [vmem:[#allocation5 + $0x10] sm:$0xff]   ;;  %v3984_v33 = vpack.c.bf16 %v3972_v26, %v3970_v25 }
  0x2d   :  { %v80_v32 = vld [vmem:[#allocation5 + $0x18] sm:$0xff]   ;;  %v3986_v34 = vld [vmem:[#allocation5 + $0x20] sm:$0xff]  ;;  %v3988_v35 = vld [vmem:[#allocation5 + $0x28] sm:$0xff] }
  0x2e   :  { %v3992_v36 = vpack.c.bf16 %v3988_v35, %v3986_v34 }
  0x2f LB: > { %v108_v37 = vpack.c.bf16 %v3823_v32, %v3827_v31  ;;  %v107_v38 = vpack.c.bf16 %v3831_v30, %v3835_v27  ;;  %vm109_vm0 = vcmask 392192   ;;  %s1002_s2 = sadd.s32 1, %s3839_s0   ;;  %s3866_s4 = smov 3e-06   ;;  %s3839_s0 = sphi %s4002_s0, %s4611_s0   ;;  %v3835_v27 = vphi %v77_v27, %v4610_v27   ;;  %v3831_v30 = vphi %v78_v30, %v4609_v30   ;;  %v3827_v31 = vphi %v79_v31, %v4608_v31   ;;  %v3823_v32 = vphi %v80_v32, %v4607_v32  }
  0x30   : > { %2914 = vmatprep.subr.bf16.mxu1 %v3992_v36  ;;  %2944 = vmatprep.subr.bf16.mxu0 %v3992_v36  ;;  %p101_p2 = scmp.lt.s32.totalorder %s1002_s2, 38  ;;  %s4611_s0 = smov %s1002_s2 }
  0x31   : > { %2915 = vmatpush3.bf16.msra.mxu1 %v3992_v36  ;;  %2945 = vmatpush3.bf16.msra.mxu0 %v3992_v36 }
  0x32   : > { %2920 = vmatprep.mubr.msk.bf16.mxu1 %vm109_vm0, %v3920_v6  ;;  %2950 = vmatprep.mubr.msk.bf16.mxu0 %vm109_vm0, %v3920_v6 }
  0x33   : > { %2916 = vmatprep.subr.bf16.mxu1 %v108_v37 }
  0x35   : > { %2917 = vmatpush3.bf16.msra.mxu1 %v108_v37 }
  0x36   : > { %2918 = vmatprep.subr.bf16.mxu1 %v107_v38 }
  0x39   : > { %2919 = vmatpush3.bf16.msra.mxu1 %v107_v38 }
  0x3a   : > { %2924 = vmatprep.subr.bf16.mxu1 %v3984_v33 }
  0x3c   : > { %2921 = vmatmul.mubr.msk.bf16.vlgmr.msra.gmra.mxu1 %vm109_vm0, %v3930_v10 }
  0x3d   : > { %2925 = vmatpush3.bf16.msra.mxu1 %v3984_v33 }
  0x3e   : > { %2926 = vmatprep.subr.bf16.mxu1 %v3980_v29 }
  0x41   : > { %2927 = vmatpush3.bf16.msra.mxu1 %v3980_v29 }
  0x42   : > { %2928 = vmatprep.subr.bf16.mxu1 %v3976_v28 }
  0x45   : > { %2929 = vmatpush3.bf16.msra.mxu1 %v3976_v28 }
  0x46   : > { %2930 = vmatprep.subr.bf16.mxu1 %v3968_v24 }
  0x49   : > { %2931 = vmatpush3.bf16.msra.mxu1 %v3968_v24 }
  0x4a   : > { %2932 = vmatprep.subr.bf16.mxu1 %v3958_v20 }
  0x4d   : > { %2933 = vmatpush3.bf16.msra.mxu1 %v3958_v20 }
  0x4e   : > { %2934 = vmatprep.subr.bf16.mxu1 %v3954_v19 }
  0x51   : > { %2935 = vmatpush3.bf16.msra.mxu1 %v3954_v19 }
  0x52   : > { %2936 = vmatprep.subr.bf16.mxu1 %v3944_v15 }
  0x55   : > { %2937 = vmatpush3.bf16.msra.mxu1 %v3944_v15 }
  0x56   : > { %2938 = vmatprep.subr.bf16.mxu1 %v3934_v11 }
  0x59   : > { %2939 = vmatpush3.bf16.msra.mxu1 %v3934_v11 }
  0x5a   : > { %2974 = vmatprep.subr.bf16.mxu1 %v3992_v36 }
  0xfc   : > { %v2922_v39 = vpop.f32.mrf.mxu1 }
  0xfe   : > { %v150_v40 = vpop.f32.mrf.mxu1 }
 0x100   : > { %v2923_v41 = vpop.f32.mrf.mxu1 }
 0x101   : > { %v166_v44 = vpack.c.bf16 %v2923_v41, %v2922_v39 }
 0x102   : > { %v153_v42 = vpop.f32.mrf.mxu1 }
 0x103   : > { %v165_v43 = vpack.c.bf16 %v153_v42, %v150_v40 }
 0x105   : > { %2940 = vmatprep.mubr.bf16.mxu1 %v165_v43 }
 0x106   : > { %2941 = vmatmul.mubr.bf16.vlgmr.msra.gmra.mxu1 %v166_v44 }
 0x107   : > { %2975 = vmatpush3.bf16.msra.mxu1 %v3992_v36  ;;  %2980 = vmatprep.mubr.msk.bf16.mxu1 %vm109_vm0, %v3920_v6 }
 0x1c6   : > { %v2942_v45 = vpop.f32.mrf.mxu1 }
 0x1c7   : > { %v218_v48 = vmax.f32 %v2942_v45, 0.0 }
 0x1c8   : > { %v201_v46 = vpop.f32.mrf.mxu1 }
 0x1c9   : > { %v216_v51 = vmax.f32 %v201_v46, 0.0 }
 0x1ca   : > { %v2943_v47 = vpop.f32.mrf.mxu1 }
 0x1cb   : > { %v219_v49 = vmax.f32 %v2943_v47, 0.0 }
 0x1cc   : > { %v204_v50 = vpop.f32.mrf.mxu1 }
 0x1cd   : > { %v221_v52 = vpack.c.bf16 %v219_v49, %v218_v48  ;;  %v217_v53 = vmax.f32 %v204_v50, 0.0 }
 0x1cf   : > { %v220_v54 = vpack.c.bf16 %v217_v53, %v216_v51  ;;  %2946 = vmatprep.subr.bf16.mxu0 %v221_v52 }
 0x1d0   : > { %2947 = vmatpush3.bf16.msra.mxu0 %v221_v52 }
 0x1d1   : > { %2948 = vmatprep.subr.bf16.mxu0 %v220_v54 }
 0x1d4   : > { %2949 = vmatpush3.bf16.msra.mxu0 %v220_v54 }
 0x1d5   : > { %2954 = vmatprep.subr.bf16.mxu0 %v3984_v33 }
 0x1d7   : > { %2951 = vmatmul.mubr.msk.bf16.vlgmr.msra.gmra.mxu0 %vm109_vm0, %v3930_v10 }
 0x1d8   : > { %2955 = vmatpush3.bf16.msra.mxu0 %v3984_v33 }
 0x1d9   : > { %2956 = vmatprep.subr.bf16.mxu0 %v3980_v29 }
 0x1dc   : > { %2957 = vmatpush3.bf16.msra.mxu0 %v3980_v29 }
 0x1dd   : > { %2958 = vmatprep.subr.bf16.mxu0 %v3976_v28 }
 0x1e0   : > { %2959 = vmatpush3.bf16.msra.mxu0 %v3976_v28 }
 0x1e1   : > { %2960 = vmatprep.subr.bf16.mxu0 %v3968_v24 }
 0x1e4   : > { %2961 = vmatpush3.bf16.msra.mxu0 %v3968_v24 }
 0x1e5   : > { %2962 = vmatprep.subr.bf16.mxu0 %v3958_v20 }
 0x1e8   : > { %2963 = vmatpush3.bf16.msra.mxu0 %v3958_v20 }
 0x1e9   : > { %2964 = vmatprep.subr.bf16.mxu0 %v3954_v19 }
 0x1ec   : > { %2965 = vmatpush3.bf16.msra.mxu0 %v3954_v19 }
 0x1ed   : > { %2966 = vmatprep.subr.bf16.mxu0 %v3944_v15 }
 0x1f0   : > { %2967 = vmatpush3.bf16.msra.mxu0 %v3944_v15 }
 0x1f1   : > { %2968 = vmatprep.subr.bf16.mxu0 %v3934_v11 }
 0x1f4   : > { %2969 = vmatpush3.bf16.msra.mxu0 %v3934_v11 }
 0x1f5   : > { %3004 = vmatprep.subr.bf16.mxu0 %v3992_v36 }
 0x297   : > { %v2952_v55 = vpop.f32.mrf.mxu0 }
 0x299   : > { %v256_v56 = vpop.f32.mrf.mxu0 }
 0x29b   : > { %v2953_v57 = vpop.f32.mrf.mxu0 }
 0x29c   : > { %v272_v60 = vpack.c.bf16 %v2953_v57, %v2952_v55 }
 0x29d   : > { %v259_v58 = vpop.f32.mrf.mxu0 }
 0x29e   : > { %v271_v59 = vpack.c.bf16 %v259_v58, %v256_v56 }
 0x2a0   : > { %2970 = vmatprep.mubr.bf16.mxu0 %v271_v59 }
 0x2a1   : > { %2971 = vmatmul.mubr.bf16.vlgmr.msra.gmra.mxu0 %v272_v60 }
 0x2a2   : > { %3005 = vmatpush3.bf16.msra.mxu0 %v3992_v36  ;;  %3010 = vmatprep.mubr.msk.bf16.mxu0 %vm109_vm0, %v3920_v6 }
 0x361   : > { %v2972_v61 = vpop.f32.mrf.mxu0 }
 0x362   : > { %v324_v27 = vmax.f32 %v2972_v61, 0.0 }
 0x363   : > { %v307_v62 = vpop.f32.mrf.mxu0 }
 0x364   : > { %v322_v32 = vmax.f32 %v307_v62, 0.0 }
 0x365   : > { %v2973_v63 = vpop.f32.mrf.mxu0 }
 0x366   : > { %v325_v30 = vmax.f32 %v2973_v63, 0.0 }
 0x367   : > { %v310_v31 = vpop.f32.mrf.mxu0 }
 0x368   : > { %v327_v37 = vpack.c.bf16 %v325_v30, %v324_v27  ;;  %v323_v38 = vmax.f32 %v310_v31, 0.0 }
 0x36a   : > { %v326_v39 = vpack.c.bf16 %v323_v38, %v322_v32  ;;  %2976 = vmatprep.subr.bf16.mxu1 %v327_v37 }
 0x36b   : > { %2977 = vmatpush3.bf16.msra.mxu1 %v327_v37 }
 0x36c   : > { %2978 = vmatprep.subr.bf16.mxu1 %v326_v39 }
 0x36f   : > { %2979 = vmatpush3.bf16.msra.mxu1 %v326_v39 }
 0x370   : > { %2984 = vmatprep.subr.bf16.mxu1 %v3984_v33 }
 0x372   : > { %2981 = vmatmul.mubr.msk.bf16.vlgmr.msra.gmra.mxu1 %vm109_vm0, %v3930_v10 }
 0x373   : > { %2985 = vmatpush3.bf16.msra.mxu1 %v3984_v33 }
 0x374   : > { %2986 = vmatprep.subr.bf16.mxu1 %v3980_v29 }
 0x377   : > { %2987 = vmatpush3.bf16.msra.mxu1 %v3980_v29 }
 0x378   : > { %2988 = vmatprep.subr.bf16.mxu1 %v3976_v28 }
 0x37b   : > { %2989 = vmatpush3.bf16.msra.mxu1 %v3976_v28 }
 0x37c   : > { %2990 = vmatprep.subr.bf16.mxu1 %v3968_v24 }
 0x37f   : > { %2991 = vmatpush3.bf16.msra.mxu1 %v3968_v24 }
 0x380   : > { %2992 = vmatprep.subr.bf16.mxu1 %v3958_v20 }
 0x383   : > { %2993 = vmatpush3.bf16.msra.mxu1 %v3958_v20 }
 0x384   : > { %2994 = vmatprep.subr.bf16.mxu1 %v3954_v19 }
 0x387   : > { %2995 = vmatpush3.bf16.msra.mxu1 %v3954_v19 }
 0x388   : > { %2996 = vmatprep.subr.bf16.mxu1 %v3944_v15 }
 0x38b   : > { %2997 = vmatpush3.bf16.msra.mxu1 %v3944_v15 }
 0x38c   : > { %2998 = vmatprep.subr.bf16.mxu1 %v3934_v11 }
 0x38f   : > { %2999 = vmatpush3.bf16.msra.mxu1 %v3934_v11 }
 0x390   : > { %3034 = vmatprep.subr.bf16.mxu1 %v3992_v36 }
 0x432   : > { %v2982_v40 = vpop.f32.mrf.mxu1 }
 0x434   : > { %v362_v41 = vpop.f32.mrf.mxu1 }
 0x436   : > { %v2983_v42 = vpop.f32.mrf.mxu1 }
 0x437   : > { %v378_v45 = vpack.c.bf16 %v2983_v42, %v2982_v40 }
 0x438   : > { %v365_v43 = vpop.f32.mrf.mxu1 }
 0x439   : > { %v377_v44 = vpack.c.bf16 %v365_v43, %v362_v41 }
 0x43b   : > { %3000 = vmatprep.mubr.bf16.mxu1 %v377_v44 }
 0x43c   : > { %3001 = vmatmul.mubr.bf16.vlgmr.msra.gmra.mxu1 %v378_v45 }
 0x43d   : > { %3035 = vmatpush3.bf16.msra.mxu1 %v3992_v36  ;;  %3040 = vmatprep.mubr.msk.bf16.mxu1 %vm109_vm0, %v3920_v6 }
 0x4fc   : > { %v3002_v46 = vpop.f32.mrf.mxu1 }
 0x4fd   : > { %v430_v49 = vmax.f32 %v3002_v46, 0.0 }
 0x4fe   : > { %v413_v47 = vpop.f32.mrf.mxu1 }
 0x4ff   : > { %v428_v52 = vmax.f32 %v413_v47, 0.0 }
 0x500   : > { %v3003_v48 = vpop.f32.mrf.mxu1 }
 0x501   : > { %v431_v50 = vmax.f32 %v3003_v48, 0.0 }
 0x502   : > { %v416_v51 = vpop.f32.mrf.mxu1 }
 0x503   : > { %v433_v53 = vpack.c.bf16 %v431_v50, %v430_v49  ;;  %v429_v54 = vmax.f32 %v416_v51, 0.0 }
 0x505   : > { %v432_v55 = vpack.c.bf16 %v429_v54, %v428_v52  ;;  %3006 = vmatprep.subr.bf16.mxu0 %v433_v53 }
 0x506   : > { %3007 = vmatpush3.bf16.msra.mxu0 %v433_v53 }
 0x507   : > { %3008 = vmatprep.subr.bf16.mxu0 %v432_v55 }
 0x50a   : > { %3009 = vmatpush3.bf16.msra.mxu0 %v432_v55 }
 0x50b   : > { %3014 = vmatprep.subr.bf16.mxu0 %v3984_v33 }
 0x50d   : > { %3011 = vmatmul.mubr.msk.bf16.vlgmr.msra.gmra.mxu0 %vm109_vm0, %v3930_v10 }
 0x50e   : > { %3015 = vmatpush3.bf16.msra.mxu0 %v3984_v33 }
 0x50f   : > { %3016 = vmatprep.subr.bf16.mxu0 %v3980_v29 }
 0x512   : > { %3017 = vmatpush3.bf16.msra.mxu0 %v3980_v29 }
 0x513   : > { %3018 = vmatprep.subr.bf16.mxu0 %v3976_v28 }
 0x516   : > { %3019 = vmatpush3.bf16.msra.mxu0 %v3976_v28 }
 0x517   : > { %3020 = vmatprep.subr.bf16.mxu0 %v3968_v24 }
 0x51a   : > { %3021 = vmatpush3.bf16.msra.mxu0 %v3968_v24 }
 0x51b   : > { %3022 = vmatprep.subr.bf16.mxu0 %v3958_v20 }
 0x51e   : > { %3023 = vmatpush3.bf16.msra.mxu0 %v3958_v20 }
 0x51f   : > { %3024 = vmatprep.subr.bf16.mxu0 %v3954_v19 }
 0x522   : > { %3025 = vmatpush3.bf16.msra.mxu0 %v3954_v19 }
 0x523   : > { %3026 = vmatprep.subr.bf16.mxu0 %v3944_v15 }
 0x526   : > { %3027 = vmatpush3.bf16.msra.mxu0 %v3944_v15 }
 0x527   : > { %3028 = vmatprep.subr.bf16.mxu0 %v3934_v11 }
 0x52a   : > { %3029 = vmatpush3.bf16.msra.mxu0 %v3934_v11 }
 0x52b   : > { %3064 = vmatprep.subr.bf16.mxu0 %v3992_v36 }
 0x5cd   : > { %v3012_v56 = vpop.f32.mrf.mxu0 }
 0x5cf   : > { %v468_v57 = vpop.f32.mrf.mxu0 }
 0x5d1   : > { %v3013_v58 = vpop.f32.mrf.mxu0 }
 0x5d2   : > { %v484_v61 = vpack.c.bf16 %v3013_v58, %v3012_v56 }
 0x5d3   : > { %v471_v59 = vpop.f32.mrf.mxu0 }
 0x5d4   : > { %v483_v60 = vpack.c.bf16 %v471_v59, %v468_v57 }
 0x5d6   : > { %3030 = vmatprep.mubr.bf16.mxu0 %v483_v60 }
 0x5d7   : > { %3031 = vmatmul.mubr.bf16.vlgmr.msra.gmra.mxu0 %v484_v61 }
 0x5d8   : > { %3065 = vmatpush3.bf16.msra.mxu0 %v3992_v36  ;;  %3070 = vmatprep.mubr.msk.bf16.mxu0 %vm109_vm0, %v3920_v6 }
 0x697   : > { %v3032_v62 = vpop.f32.mrf.mxu0 }
 0x698   : > { %v536_v30 = vmax.f32 %v3032_v62, 0.0 }
 0x699   : > { %v519_v63 = vpop.f32.mrf.mxu0 }
 0x69a   : > { %v534_v37 = vmax.f32 %v519_v63, 0.0 }
 0x69b   : > { %v3033_v27 = vpop.f32.mrf.mxu0 }
 0x69c   : > { %v537_v31 = vmax.f32 %v3033_v27, 0.0 }
 0x69d   : > { %v522_v32 = vpop.f32.mrf.mxu0 }
 0x69e   : > { %v539_v38 = vpack.c.bf16 %v537_v31, %v536_v30  ;;  %v535_v39 = vmax.f32 %v522_v32, 0.0 }
 0x6a0   : > { %v538_v40 = vpack.c.bf16 %v535_v39, %v534_v37  ;;  %3036 = vmatprep.subr.bf16.mxu1 %v539_v38 }
 0x6a1   : > { %3037 = vmatpush3.bf16.msra.mxu1 %v539_v38 }
 0x6a2   : > { %3038 = vmatprep.subr.bf16.mxu1 %v538_v40 }
 0x6a5   : > { %3039 = vmatpush3.bf16.msra.mxu1 %v538_v40 }
 0x6a6   : > { %3044 = vmatprep.subr.bf16.mxu1 %v3984_v33 }
 0x6a8   : > { %3041 = vmatmul.mubr.msk.bf16.vlgmr.msra.gmra.mxu1 %vm109_vm0, %v3930_v10 }
 0x6a9   : > { %3045 = vmatpush3.bf16.msra.mxu1 %v3984_v33 }
 0x6aa   : > { %3046 = vmatprep.subr.bf16.mxu1 %v3980_v29 }
 0x6ad   : > { %3047 = vmatpush3.bf16.msra.mxu1 %v3980_v29 }
 0x6ae   : > { %3048 = vmatprep.subr.bf16.mxu1 %v3976_v28 }
 0x6b1   : > { %3049 = vmatpush3.bf16.msra.mxu1 %v3976_v28 }
 0x6b2   : > { %3050 = vmatprep.subr.bf16.mxu1 %v3968_v24 }
 0x6b5   : > { %3051 = vmatpush3.bf16.msra.mxu1 %v3968_v24 }
 0x6b6   : > { %3052 = vmatprep.subr.bf16.mxu1 %v3958_v20 }
 0x6b9   : > { %3053 = vmatpush3.bf16.msra.mxu1 %v3958_v20 }
 0x6ba   : > { %3054 = vmatprep.subr.bf16.mxu1 %v3954_v19 }
 0x6bd   : > { %3055 = vmatpush3.bf16.msra.mxu1 %v3954_v19 }
 0x6be   : > { %3056 = vmatprep.subr.bf16.mxu1 %v3944_v15 }
 0x6c1   : > { %3057 = vmatpush3.bf16.msra.mxu1 %v3944_v15 }
 0x6c2   : > { %3058 = vmatprep.subr.bf16.mxu1 %v3934_v11 }
 0x6c5   : > { %3059 = vmatpush3.bf16.msra.mxu1 %v3934_v11 }
 0x6c6   : > { %3094 = vmatprep.subr.bf16.mxu1 %v3992_v36 }
 0x768   : > { %v3042_v41 = vpop.f32.mrf.mxu1 }
 0x76a   : > { %v574_v42 = vpop.f32.mrf.mxu1 }
 0x76c   : > { %v3043_v43 = vpop.f32.mrf.mxu1 }
 0x76d   : > { %v590_v46 = vpack.c.bf16 %v3043_v43, %v3042_v41 }
 0x76e   : > { %v577_v44 = vpop.f32.mrf.mxu1 }
 0x76f   : > { %v589_v45 = vpack.c.bf16 %v577_v44, %v574_v42 }
 0x771   : > { %3060 = vmatprep.mubr.bf16.mxu1 %v589_v45 }
 0x772   : > { %3061 = vmatmul.mubr.bf16.vlgmr.msra.gmra.mxu1 %v590_v46 }
 0x773   : > { %3095 = vmatpush3.bf16.msra.mxu1 %v3992_v36  ;;  %3100 = vmatprep.mubr.msk.bf16.mxu1 %vm109_vm0, %v3920_v6 }
 0x832   : > { %v3062_v47 = vpop.f32.mrf.mxu1 }
 0x833   : > { %v642_v50 = vmax.f32 %v3062_v47, 0.0 }
 0x834   : > { %v625_v48 = vpop.f32.mrf.mxu1 }
 0x835   : > { %v640_v53 = vmax.f32 %v625_v48, 0.0 }
 0x836   : > { %v3063_v49 = vpop.f32.mrf.mxu1 }
 0x837   : > { %v643_v51 = vmax.f32 %v3063_v49, 0.0 }
 0x838   : > { %v628_v52 = vpop.f32.mrf.mxu1 }
 0x839   : > { %v645_v54 = vpack.c.bf16 %v643_v51, %v642_v50  ;;  %v641_v55 = vmax.f32 %v628_v52, 0.0 }
 0x83b   : > { %v644_v56 = vpack.c.bf16 %v641_v55, %v640_v53  ;;  %3066 = vmatprep.subr.bf16.mxu0 %v645_v54 }
 0x83c   : > { %3067 = vmatpush3.bf16.msra.mxu0 %v645_v54 }
 0x83d   : > { %3068 = vmatprep.subr.bf16.mxu0 %v644_v56 }
 0x840   : > { %3069 = vmatpush3.bf16.msra.mxu0 %v644_v56 }
 0x841   : > { %3074 = vmatprep.subr.bf16.mxu0 %v3984_v33 }
 0x843   : > { %3071 = vmatmul.mubr.msk.bf16.vlgmr.msra.gmra.mxu0 %vm109_vm0, %v3930_v10 }
 0x844   : > { %3075 = vmatpush3.bf16.msra.mxu0 %v3984_v33 }
 0x845   : > { %3076 = vmatprep.subr.bf16.mxu0 %v3980_v29 }
 0x848   : > { %3077 = vmatpush3.bf16.msra.mxu0 %v3980_v29 }
 0x849   : > { %3078 = vmatprep.subr.bf16.mxu0 %v3976_v28 }
 0x84c   : > { %3079 = vmatpush3.bf16.msra.mxu0 %v3976_v28 }
 0x84d   : > { %3080 = vmatprep.subr.bf16.mxu0 %v3968_v24 }
 0x850   : > { %3081 = vmatpush3.bf16.msra.mxu0 %v3968_v24 }
 0x851   : > { %3082 = vmatprep.subr.bf16.mxu0 %v3958_v20 }
 0x854   : > { %3083 = vmatpush3.bf16.msra.mxu0 %v3958_v20 }
 0x855   : > { %3084 = vmatprep.subr.bf16.mxu0 %v3954_v19 }
 0x858   : > { %3085 = vmatpush3.bf16.msra.mxu0 %v3954_v19 }
 0x859   : > { %3086 = vmatprep.subr.bf16.mxu0 %v3944_v15 }
 0x85c   : > { %3087 = vmatpush3.bf16.msra.mxu0 %v3944_v15 }
 0x85d   : > { %3088 = vmatprep.subr.bf16.mxu0 %v3934_v11 }
 0x860   : > { %3089 = vmatpush3.bf16.msra.mxu0 %v3934_v11 }
 0x861   : > { %3124 = vmatprep.subr.bf16.mxu0 %v3992_v36 }
 0x903   : > { %v3072_v57 = vpop.f32.mrf.mxu0 }
 0x905   : > { %v680_v58 = vpop.f32.mrf.mxu0 }
 0x907   : > { %v3073_v59 = vpop.f32.mrf.mxu0 }
 0x908   : > { %v696_v62 = vpack.c.bf16 %v3073_v59, %v3072_v57 }
 0x909   : > { %v683_v60 = vpop.f32.mrf.mxu0 }
 0x90a   : > { %v695_v61 = vpack.c.bf16 %v683_v60, %v680_v58 }
 0x90c   : > { %3090 = vmatprep.mubr.bf16.mxu0 %v695_v61 }
 0x90d   : > { %3091 = vmatmul.mubr.bf16.vlgmr.msra.gmra.mxu0 %v696_v62 }
 0x90e   : > { %3125 = vmatpush3.bf16.msra.mxu0 %v3992_v36  ;;  %3130 = vmatprep.mubr.msk.bf16.mxu0 %vm109_vm0, %v3920_v6 }
 0x9cd   : > { %v3092_v63 = vpop.f32.mrf.mxu0 }
 0x9ce   : > { %v748_v31 = vmax.f32 %v3092_v63, 0.0 }
 0x9cf   : > { %v731_v27 = vpop.f32.mrf.mxu0 }
 0x9d0   : > { %v746_v38 = vmax.f32 %v731_v27, 0.0 }
 0x9d1   : > { %v3093_v30 = vpop.f32.mrf.mxu0 }
 0x9d2   : > { %v749_v32 = vmax.f32 %v3093_v30, 0.0 }
 0x9d3   : > { %v734_v37 = vpop.f32.mrf.mxu0 }
 0x9d4   : > { %v751_v39 = vpack.c.bf16 %v749_v32, %v748_v31  ;;  %v747_v40 = vmax.f32 %v734_v37, 0.0 }
 0x9d6   : > { %v750_v41 = vpack.c.bf16 %v747_v40, %v746_v38  ;;  %3096 = vmatprep.subr.bf16.mxu1 %v751_v39 }
 0x9d7   : > { %3097 = vmatpush3.bf16.msra.mxu1 %v751_v39 }
 0x9d8   : > { %3098 = vmatprep.subr.bf16.mxu1 %v750_v41 }
 0x9db   : > { %3099 = vmatpush3.bf16.msra.mxu1 %v750_v41 }
 0x9dc   : > { %3104 = vmatprep.subr.bf16.mxu1 %v3984_v33 }
 0x9de   : > { %3101 = vmatmul.mubr.msk.bf16.vlgmr.msra.gmra.mxu1 %vm109_vm0, %v3930_v10 }
 0x9df   : > { %3105 = vmatpush3.bf16.msra.mxu1 %v3984_v33 }
 0x9e0   : > { %3106 = vmatprep.subr.bf16.mxu1 %v3980_v29 }
 0x9e3   : > { %3107 = vmatpush3.bf16.msra.mxu1 %v3980_v29 }
 0x9e4   : > { %3108 = vmatprep.subr.bf16.mxu1 %v3976_v28 }
 0x9e7   : > { %3109 = vmatpush3.bf16.msra.mxu1 %v3976_v28 }
 0x9e8   : > { %3110 = vmatprep.subr.bf16.mxu1 %v3968_v24 }
 0x9eb   : > { %3111 = vmatpush3.bf16.msra.mxu1 %v3968_v24 }
 0x9ec   : > { %3112 = vmatprep.subr.bf16.mxu1 %v3958_v20 }
 0x9ef   : > { %3113 = vmatpush3.bf16.msra.mxu1 %v3958_v20 }
 0x9f0   : > { %3114 = vmatprep.subr.bf16.mxu1 %v3954_v19 }
 0x9f3   : > { %3115 = vmatpush3.bf16.msra.mxu1 %v3954_v19 }
 0x9f4   : > { %3116 = vmatprep.subr.bf16.mxu1 %v3944_v15 }
 0x9f7   : > { %3117 = vmatpush3.bf16.msra.mxu1 %v3944_v15 }
 0x9f8   : > { %3118 = vmatprep.subr.bf16.mxu1 %v3934_v11 }
 0x9fb   : > { %3119 = vmatpush3.bf16.msra.mxu1 %v3934_v11 }
 0xa9e   : > { %v3102_v42 = vpop.f32.mrf.mxu1 }
 0xaa0   : > { %v786_v43 = vpop.f32.mrf.mxu1 }
 0xaa2   : > { %v3103_v44 = vpop.f32.mrf.mxu1 }
 0xaa3   : > { %v802_v47 = vpack.c.bf16 %v3103_v44, %v3102_v42 }
 0xaa4   : > { %v789_v45 = vpop.f32.mrf.mxu1 }
 0xaa5   : > { %v801_v46 = vpack.c.bf16 %v789_v45, %v786_v43 }
 0xaa7   : > { %3120 = vmatprep.mubr.bf16.mxu1 %v801_v46 }
 0xaa8   : > { %3121 = vmatmul.mubr.bf16.vlgmr.msra.gmra.mxu1 %v802_v47 }
 0xb68   : > { %v3122_v48 = vpop.f32.mrf.mxu1 }
 0xb69   : > { %v854_v51 = vmax.f32 %v3122_v48, 0.0 }
 0xb6a   : > { %v837_v49 = vpop.f32.mrf.mxu1 }
 0xb6b   : > { %v852_v54 = vmax.f32 %v837_v49, 0.0 }
 0xb6c   : > { %v3123_v50 = vpop.f32.mrf.mxu1 }
 0xb6d   : > { %v855_v52 = vmax.f32 %v3123_v50, 0.0 }
 0xb6e   : > { %v840_v53 = vpop.f32.mrf.mxu1 }
 0xb6f   : > { %v857_v55 = vpack.c.bf16 %v855_v52, %v854_v51  ;;  %v853_v56 = vmax.f32 %v840_v53, 0.0 }
 0xb71   : > { %v856_v57 = vpack.c.bf16 %v853_v56, %v852_v54  ;;  %3126 = vmatprep.subr.bf16.mxu0 %v857_v55 }
 0xb72   : > { %3127 = vmatpush3.bf16.msra.mxu0 %v857_v55 }
 0xb73   : > { %3128 = vmatprep.subr.bf16.mxu0 %v856_v57 }
 0xb76   : > { %3129 = vmatpush3.bf16.msra.mxu0 %v856_v57 }
 0xb77   : > { %3134 = vmatprep.subr.bf16.mxu0 %v3984_v33 }
 0xb79   : > { %3131 = vmatmul.mubr.msk.bf16.vlgmr.msra.gmra.mxu0 %vm109_vm0, %v3930_v10 }
 0xb7a   : > { %3135 = vmatpush3.bf16.msra.mxu0 %v3984_v33 }
 0xb7b   : > { %3136 = vmatprep.subr.bf16.mxu0 %v3980_v29 }
 0xb7e   : > { %3137 = vmatpush3.bf16.msra.mxu0 %v3980_v29 }
 0xb7f   : > { %3138 = vmatprep.subr.bf16.mxu0 %v3976_v28 }
 0xb82   : > { %3139 = vmatpush3.bf16.msra.mxu0 %v3976_v28 }
 0xb83   : > { %3140 = vmatprep.subr.bf16.mxu0 %v3968_v24 }
 0xb86   : > { %3141 = vmatpush3.bf16.msra.mxu0 %v3968_v24 }
 0xb87   : > { %3142 = vmatprep.subr.bf16.mxu0 %v3958_v20 }
 0xb8a   : > { %3143 = vmatpush3.bf16.msra.mxu0 %v3958_v20 }
 0xb8b   : > { %3144 = vmatprep.subr.bf16.mxu0 %v3954_v19 }
 0xb8e   : > { %3145 = vmatpush3.bf16.msra.mxu0 %v3954_v19 }
 0xb8f   : > { %3146 = vmatprep.subr.bf16.mxu0 %v3944_v15 }
 0xb92   : > { %3147 = vmatpush3.bf16.msra.mxu0 %v3944_v15 }
 0xb93   : > { %3148 = vmatprep.subr.bf16.mxu0 %v3934_v11 }
 0xb96   : > { %3149 = vmatpush3.bf16.msra.mxu0 %v3934_v11 }
 0xc39   : > { %v3132_v58 = vpop.f32.mrf.mxu0 }
 0xc3b   : > { %v892_v59 = vpop.f32.mrf.mxu0 }
 0xc3d   : > { %v3133_v60 = vpop.f32.mrf.mxu0 }
 0xc3e   : > { %v908_v63 = vpack.c.bf16 %v3133_v60, %v3132_v58 }
 0xc3f   : > { %v895_v61 = vpop.f32.mrf.mxu0 }
 0xc40   : > { %v907_v62 = vpack.c.bf16 %v895_v61, %v892_v59 }
 0xc42   : > { %3150 = vmatprep.mubr.bf16.mxu0 %v907_v62 }
 0xc43   : > { %3151 = vmatmul.mubr.bf16.vlgmr.msra.gmra.mxu0 %v908_v63 }
 0xd03   : > { %v3152_v27 = vpop.f32.mrf.mxu0 }
 0xd04   : > { %v960_v37 = vmax.f32 %v3152_v27, 0.0  }
 0xd05   : > { %v943_v30 = vpop.f32.mrf.mxu0 }
 0xd06   : > { %v958_v38 = vmax.f32 %v943_v30, 0.0   ;;  %v964_v32 = vsub.f32 %v960_v37, %v854_v51  ;;  %v984_v58 = vand.u32 2147483647, %v960_v37 }
 0xd07   : > { %v3153_v31 = vpop.f32.mrf.mxu0 }
 0xd08   : > { %v961_v39 = vmax.f32 %v3153_v31, 0.0   ;;  %v962_v41 = vsub.f32 %v958_v38, %v852_v54  ;;  %v968_v46 = vand.u32 2147483647, %v964_v32  ;;  %v982_v50 = vand.u32 2147483647, %v958_v38 }
 0xd09   : > { %v946_v40 = vpop.f32.mrf.mxu0 }
 0xd0a   : > { %v965_v42 = vsub.f32 %v961_v39, %v855_v52  ;;  %v959_v43 = vmax.f32 %v946_v40, 0.0   ;;  %v966_v47 = vand.u32 2147483647, %v962_v41  ;;  %v985_v53 = vand.u32 2147483647, %v961_v39 }
 0xd0c   : > { %v969_v44 = vand.u32 2147483647, %v965_v42  ;;  %v963_v45 = vsub.f32 %v959_v43, %v853_v56  ;;  %v983_v49 = vand.u32 2147483647, %v959_v43  ;;  %v987_v51 = vmax.f32.f32 %v984_v58, %v985_v53 }
 0xd0e   : > { %v967_v48 = vand.u32 2147483647, %v963_v45  ;;  %v971_v57 = vmax.f32.f32 %v968_v46, %v969_v44  ;;  %v986_v60 = vmax.f32.f32 %v982_v50, %v983_v49 }
 0xd10   : > { %v970_v55 = vmax.f32.f32 %v966_v47, %v967_v48  ;;  %v988_v61 = vmax.f32.f32 %v986_v60, %v987_v51 }
 0xd12   : > { %v972_v59 = vmax.f32.f32 %v970_v55, %v971_v57 }
 0xd14   : > { %973 = vmax.xlane.f32.xlu0 %v972_v59 }
 0xd18   : > { %989 = vmax.xlane.f32.xlu0 %v988_v61 }
 0xd9d   : > { %v974_v52 = vpop.xlane.xlu0 %973 }
 0xd9e   : > { %v975_v54 = vrot.slane %v974_v52, 4 }
 0xda0   : > { %v976_v56 = vmax.f32 %v974_v52, %v975_v54 }
 0xda1   : > { %v990_v62 = vpop.xlane.xlu0 %989 }
 0xda2   : > { %v977_v63 = vrot.slane %v976_v56, 2  ;;  %v991_v27 = vrot.slane %v990_v62, 4 }
 0xda4   : > { %v992_v30 = vmax.f32 %v990_v62, %v991_v27  ;;  %v978_v31 = vmax.f32 %v976_v56, %v977_v63  ;;  %v4610_v27 = vmov %v958_v38 }
 0xda6   : > { %v993_v32 = vrot.slane %v992_v30, 2  ;;  %v979_v40 = vrot.slane %v978_v31, 1 }
 0xda8   : > { %v994_v41 = vmax.f32 %v992_v30, %v993_v32  ;;  %v980_v42 = vmax.f32 %v978_v31, %v979_v40  ;;  %v4607_v32 = vmov %v961_v39  ;;  %v4608_v31 = vmov %v960_v37 }
 0xda9   : > { %v4609_v30 = vmov %v959_v43 }
 0xdaa   : > { %3602 = vpush %v980_v42  ;;  %v995_v44 = vrot.slane %v994_v41, 1 }
 0xdac   : > { %v996_v45 = vmax.f32 %v994_v41, %v995_v44 }
 0xdae   : > { %3604 = vpush %v996_v45 }
 0xddb   : > { %s3603_s28 = spop %3602 }
 0xddf   : > { %s3605_s29 = spop %3604 }
 0xde0   : > { %s998_s30 = smul.f32 0.01, %s3605_s29 }
 0xde2   : > { %s999_s5 = smax.f32 %s3866_s4, %s998_s30 }
 0xde3   : > { %p1000_p1 = scmp.lt.f32.partialorder %s3603_s28, %s999_s5 }
 0xde5   : > { %s1001_s6 = scalar_select %p1000_p1, 1, 0 }
 0xde7   : > { %p102_p3 = scmp.eq.s32.totalorder %s1001_s6, 0 }
 0xde9   : > { %p103_p4 = pnand %p102_p3, %p101_p2 }
 0xdea   :  { %s4210_s7 = smov (%p103_p4), 0  }
 0xdeb   :  { %106 = sbr.rel (!%p103_p4) target bundleno = 47 (0x2f), region = 58 }
 0xdf0 LB: > { %3154 = vmatprep.subr.mxu1 %v3988_v35  ;;  %3166 = vmatprep.mubr.msk.f32.mxu1 %vm109_vm0, %v3906_v0  ;;  %s2443_s7 = sadd.s32 1, %s3859_s7   ;;  %s3859_s7 = sphi %s4210_s7, %s2443_s7   ;;  %v3855_v38 = vphi %v958_v38, %v4615_v38   ;;  %v3851_v43 = vphi %v959_v43, %v4614_v43   ;;  %v3847_v37 = vphi %v960_v37, %v4613_v37   ;;  %v3843_v39 = vphi %v961_v39, %v4612_v39  }
 0xdf1   : > { %3155 = vmatpush3.msra.mxu1 %v3988_v35  ;;  %3210 = vmatprep.subr.mxu0 %v3988_v35  ;;  %p1010_p6 = scmp.lt.s32.totalorder %s2443_s7, 8 }
 0xdf2   : > { %3156 = vmatprep.subr.mxu1 %v3986_v34  ;;  %3211 = vmatpush3.msra.mxu0 %v3988_v35 }
 0xdf3   : > { %3157 = vmatpush3.msra.mxu1 %v3986_v34  ;;  %3212 = vmatprep.subr.mxu0 %v3986_v34 }
 0xdf4   : > { %3158 = vmatprep.subr.mxu1 %v3843_v39  ;;  %3213 = vmatpush3.msra.mxu0 %v3986_v34 }
 0xdf5   : > { %3159 = vmatpush3.msra.mxu1 %v3843_v39  ;;  %3222 = vmatprep.mubr.msk.f32.mxu0 %vm109_vm0, %v3906_v0 }
 0xdf6   : > { %3160 = vmatprep.subr.mxu1 %v3847_v37 }
 0xdf7   : > { %3161 = vmatpush3.msra.mxu1 %v3847_v37 }
 0xdf8   : > { %3162 = vmatprep.subr.mxu1 %v3851_v43 }
 0xdf9   : > { %3163 = vmatpush3.msra.mxu1 %v3851_v43 }
 0xdfa   : > { %3164 = vmatprep.subr.mxu1 %v3855_v38 }
 0xdfb   : > { %3165 = vmatpush3.msra.mxu1 %v3855_v38 }
 0xdfc   : > { %3167 = vmatmul.mubr.msk.f32.vlgmr.msra.gmra.mxu1 %vm109_vm0, %v3908_v1  ;;  %3172 = vmatprep.subr.mxu1 %v3972_v26 }
 0xdfd   : > { %3169 = vmatprep.mubr.msk.f32.mxu1 %vm109_vm0, %v3910_v2  ;;  %3173 = vmatpush3.msra.mxu1 %v3972_v26 }
 0xdfe   : > { %3174 = vmatprep.subr.mxu1 %v3970_v25 }
 0xdff   : > { %3175 = vmatpush3.msra.mxu1 %v3970_v25 }
 0xe00   : > { %3170 = vmatmul.mubr.msk.f32.gmra.mxu1 %vm109_vm0, %v3912_v3  ;;  %3176 = vmatprep.subr.mxu1 %v3964_v23 }
 0xe01   : > { %3177 = vmatpush3.msra.mxu1 %v3964_v23 }
 0xe02   : > { %3178 = vmatprep.subr.mxu1 %v3962_v22 }
 0xe03   : > { %3179 = vmatpush3.msra.mxu1 %v3962_v22 }
 0xe04   : > { %3180 = vmatprep.subr.mxu1 %v3960_v21 }
 0xe05   : > { %3181 = vmatpush3.msra.mxu1 %v3960_v21 }
 0xe06   : > { %3182 = vmatprep.subr.mxu1 %v3950_v18 }
 0xe07   : > { %3183 = vmatpush3.msra.mxu1 %v3950_v18 }
 0xe08   : > { %3184 = vmatprep.subr.mxu1 %v3948_v17 }
 0xe09   : > { %3185 = vmatpush3.msra.mxu1 %v3948_v17 }
 0xe0a   : > { %3186 = vmatprep.subr.mxu1 %v3946_v16 }
 0xe0b   : > { %3187 = vmatpush3.msra.mxu1 %v3946_v16 }
 0xe0c   : > { %3188 = vmatprep.subr.mxu1 %v3940_v14 }
 0xe0d   : > { %3189 = vmatpush3.msra.mxu1 %v3940_v14 }
 0xe0e   : > { %3190 = vmatprep.subr.mxu1 %v3938_v13 }
 0xe0f   : > { %3191 = vmatpush3.msra.mxu1 %v3938_v13 }
 0xe10   : > { %3192 = vmatprep.subr.mxu1 %v3936_v12 }
 0xe11   : > { %3193 = vmatpush3.msra.mxu1 %v3936_v12 }
 0xe12   : > { %3194 = vmatprep.subr.mxu1 %v3926_v9 }
 0xe13   : > { %3195 = vmatpush3.msra.mxu1 %v3926_v9 }
 0xe14   : > { %3196 = vmatprep.subr.mxu1 %v3924_v8 }
 0xe15   : > { %3197 = vmatpush3.msra.mxu1 %v3924_v8 }
 0xe16   : > { %3198 = vmatprep.subr.mxu1 %v3922_v7 }
 0xe17   : > { %3199 = vmatpush3.msra.mxu1 %v3922_v7 }
 0xe18   : > { %3200 = vmatprep.subr.mxu1 %v3916_v5 }
 0xe19   : > { %3201 = vmatpush3.msra.mxu1 %v3916_v5 }
 0xe1a   : > { %3202 = vmatprep.subr.mxu1 %v3914_v4 }
 0xe1b   : > { %3203 = vmatpush3.msra.mxu1 %v3914_v4 }
 0xe1c   : > { %3266 = vmatprep.subr.mxu1 %v3988_v35 }
 0xebc   : > { %v3168_v6 = vpop.f32.mrf.mxu1 }
 0xebe   : > { %v1095_v10 = vpop.f32.mrf.mxu1 }
 0xebf   : > { %3204 = vmatprep.mubr.f32.mxu1 %v1095_v10 }
 0xec0   : > { %v3171_v11 = vpop.f32.mrf.mxu1  ;;  %3205 = vmatmul.mubr.f32.vlgmr.msra.gmra.mxu1 %v3168_v6 }
 0xec1   : > { %3267 = vmatpush3.msra.mxu1 %v3988_v35 }
 0xec2   : > { %v1105_v15 = vpop.f32.mrf.mxu1  ;;  %3268 = vmatprep.subr.mxu1 %v3986_v34 }
 0xec3   : > { %3207 = vmatprep.mubr.f32.mxu1 %v1105_v15  ;;  %3269 = vmatpush3.msra.mxu1 %v3986_v34 }
 0xec4   : > { %3208 = vmatmul.mubr.f32.gmra.mxu1 %v3171_v11 }
 0xec5   : > { %3278 = vmatprep.mubr.msk.f32.mxu1 %vm109_vm0, %v3906_v0 }
 0xf80   : > { %v3206_v19 = vpop.f32.mrf.mxu1 }
 0xf81   : > { %v1200_v36 = vmax.f32 %v3206_v19, 0.0 }
 0xf82   : > { %v1180_v20 = vpop.f32.mrf.mxu1 }
 0xf83   : > { %v1199_v37 = vmax.f32 %v1180_v20, 0.0 }
 0xf84   : > { %v3209_v24 = vpop.f32.mrf.mxu1 }
 0xf85   : > { %v1202_v28 = vmax.f32 %v3209_v24, 0.0 }
 0xf86   : > { %v1190_v29 = vpop.f32.mrf.mxu1 }
 0xf87   : > { %v1201_v33 = vmax.f32 %v1190_v29, 0.0  ;;  %3214 = vmatprep.subr.mxu0 %v1202_v28 }
 0xf88   : > { %3215 = vmatpush3.msra.mxu0 %v1202_v28 }
 0xf89   : > { %3216 = vmatprep.subr.mxu0 %v1201_v33 }
 0xf8a   : > { %3217 = vmatpush3.msra.mxu0 %v1201_v33 }
 0xf8b   : > { %3218 = vmatprep.subr.mxu0 %v1200_v36 }
 0xf8c   : > { %3219 = vmatpush3.msra.mxu0 %v1200_v36 }
 0xf8d   : > { %3220 = vmatprep.subr.mxu0 %v1199_v37 }
 0xf8e   : > { %3221 = vmatpush3.msra.mxu0 %v1199_v37 }
 0xf8f   : > { %3223 = vmatmul.mubr.msk.f32.vlgmr.msra.gmra.mxu0 %vm109_vm0, %v3908_v1  ;;  %3228 = vmatprep.subr.mxu0 %v3972_v26 }
 0xf90   : > { %3225 = vmatprep.mubr.msk.f32.mxu0 %vm109_vm0, %v3910_v2  ;;  %3229 = vmatpush3.msra.mxu0 %v3972_v26 }
 0xf91   : > { %3230 = vmatprep.subr.mxu0 %v3970_v25 }
 0xf92   : > { %3231 = vmatpush3.msra.mxu0 %v3970_v25 }
 0xf93   : > { %3226 = vmatmul.mubr.msk.f32.gmra.mxu0 %vm109_vm0, %v3912_v3  ;;  %3232 = vmatprep.subr.mxu0 %v3964_v23 }
 0xf94   : > { %3233 = vmatpush3.msra.mxu0 %v3964_v23 }
 0xf95   : > { %3234 = vmatprep.subr.mxu0 %v3962_v22 }
 0xf96   : > { %3235 = vmatpush3.msra.mxu0 %v3962_v22 }
 0xf97   : > { %3236 = vmatprep.subr.mxu0 %v3960_v21 }
 0xf98   : > { %3237 = vmatpush3.msra.mxu0 %v3960_v21 }
 0xf99   : > { %3238 = vmatprep.subr.mxu0 %v3950_v18 }
 0xf9a   : > { %3239 = vmatpush3.msra.mxu0 %v3950_v18 }
 0xf9b   : > { %3240 = vmatprep.subr.mxu0 %v3948_v17 }
 0xf9c   : > { %3241 = vmatpush3.msra.mxu0 %v3948_v17 }
 0xf9d   : > { %3242 = vmatprep.subr.mxu0 %v3946_v16 }
 0xf9e   : > { %3243 = vmatpush3.msra.mxu0 %v3946_v16 }
 0xf9f   : > { %3244 = vmatprep.subr.mxu0 %v3940_v14 }
 0xfa0   : > { %3245 = vmatpush3.msra.mxu0 %v3940_v14 }
 0xfa1   : > { %3246 = vmatprep.subr.mxu0 %v3938_v13 }
 0xfa2   : > { %3247 = vmatpush3.msra.mxu0 %v3938_v13 }
 0xfa3   : > { %3248 = vmatprep.subr.mxu0 %v3936_v12 }
 0xfa4   : > { %3249 = vmatpush3.msra.mxu0 %v3936_v12 }
 0xfa5   : > { %3250 = vmatprep.subr.mxu0 %v3926_v9 }
 0xfa6   : > { %3251 = vmatpush3.msra.mxu0 %v3926_v9 }
 0xfa7   : > { %3252 = vmatprep.subr.mxu0 %v3924_v8 }
 0xfa8   : > { %3253 = vmatpush3.msra.mxu0 %v3924_v8 }
 0xfa9   : > { %3254 = vmatprep.subr.mxu0 %v3922_v7 }
 0xfaa   : > { %3255 = vmatpush3.msra.mxu0 %v3922_v7 }
 0xfab   : > { %3256 = vmatprep.subr.mxu0 %v3916_v5 }
 0xfac   : > { %3257 = vmatpush3.msra.mxu0 %v3916_v5 }
 0xfad   : > { %3258 = vmatprep.subr.mxu0 %v3914_v4 }
 0xfae   : > { %3259 = vmatpush3.msra.mxu0 %v3914_v4 }
 0xfaf   : > { %3322 = vmatprep.subr.mxu0 %v3988_v35 }
0x104f   : > { %v3224_v38 = vpop.f32.mrf.mxu0 }
0x1051   : > { %v1269_v39 = vpop.f32.mrf.mxu0 }
0x1052   : > { %3260 = vmatprep.mubr.f32.mxu0 %v1269_v39 }
0x1053   : > { %v3227_v43 = vpop.f32.mrf.mxu0  ;;  %3261 = vmatmul.mubr.f32.vlgmr.msra.gmra.mxu0 %v3224_v38 }
0x1054   : > { %3323 = vmatpush3.msra.mxu0 %v3988_v35 }
0x1055   : > { %v1279_v46 = vpop.f32.mrf.mxu0  ;;  %3324 = vmatprep.subr.mxu0 %v3986_v34 }
0x1056   : > { %3263 = vmatprep.mubr.f32.mxu0 %v1279_v46  ;;  %3325 = vmatpush3.msra.mxu0 %v3986_v34 }
0x1057   : > { %3264 = vmatmul.mubr.f32.gmra.mxu0 %v3227_v43 }
0x1058   : > { %3334 = vmatprep.mubr.msk.f32.mxu0 %vm109_vm0, %v3906_v0 }
0x1113   : > { %v3262_v47 = vpop.f32.mrf.mxu0 }
0x1114   : > { %v1374_v57 = vmax.f32 %v3262_v47, 0.0 }
0x1115   : > { %v1354_v48 = vpop.f32.mrf.mxu0 }
0x1116   : > { %v1373_v58 = vmax.f32 %v1354_v48, 0.0 }
0x1117   : > { %v3265_v49 = vpop.f32.mrf.mxu0 }
0x1118   : > { %v1376_v50 = vmax.f32 %v3265_v49, 0.0 }
0x1119   : > { %v1364_v53 = vpop.f32.mrf.mxu0 }
0x111a   : > { %v1375_v55 = vmax.f32 %v1364_v53, 0.0  ;;  %3270 = vmatprep.subr.mxu1 %v1376_v50 }
0x111b   : > { %3271 = vmatpush3.msra.mxu1 %v1376_v50 }
0x111c   : > { %3272 = vmatprep.subr.mxu1 %v1375_v55 }
0x111d   : > { %3273 = vmatpush3.msra.mxu1 %v1375_v55 }
0x111e   : > { %3274 = vmatprep.subr.mxu1 %v1374_v57 }
0x111f   : > { %3275 = vmatpush3.msra.mxu1 %v1374_v57 }
0x1120   : > { %3276 = vmatprep.subr.mxu1 %v1373_v58 }
0x1121   : > { %3277 = vmatpush3.msra.mxu1 %v1373_v58 }
0x1122   : > { %3279 = vmatmul.mubr.msk.f32.vlgmr.msra.gmra.mxu1 %vm109_vm0, %v3908_v1  ;;  %3284 = vmatprep.subr.mxu1 %v3972_v26 }
0x1123   : > { %3281 = vmatprep.mubr.msk.f32.mxu1 %vm109_vm0, %v3910_v2  ;;  %3285 = vmatpush3.msra.mxu1 %v3972_v26 }
0x1124   : > { %3286 = vmatprep.subr.mxu1 %v3970_v25 }
0x1125   : > { %3287 = vmatpush3.msra.mxu1 %v3970_v25 }
0x1126   : > { %3282 = vmatmul.mubr.msk.f32.gmra.mxu1 %vm109_vm0, %v3912_v3  ;;  %3288 = vmatprep.subr.mxu1 %v3964_v23 }
0x1127   : > { %3289 = vmatpush3.msra.mxu1 %v3964_v23 }
0x1128   : > { %3290 = vmatprep.subr.mxu1 %v3962_v22 }
0x1129   : > { %3291 = vmatpush3.msra.mxu1 %v3962_v22 }
0x112a   : > { %3292 = vmatprep.subr.mxu1 %v3960_v21 }
0x112b   : > { %3293 = vmatpush3.msra.mxu1 %v3960_v21 }
0x112c   : > { %3294 = vmatprep.subr.mxu1 %v3950_v18 }
0x112d   : > { %3295 = vmatpush3.msra.mxu1 %v3950_v18 }
0x112e   : > { %3296 = vmatprep.subr.mxu1 %v3948_v17 }
0x112f   : > { %3297 = vmatpush3.msra.mxu1 %v3948_v17 }
0x1130   : > { %3298 = vmatprep.subr.mxu1 %v3946_v16 }
0x1131   : > { %3299 = vmatpush3.msra.mxu1 %v3946_v16 }
0x1132   : > { %3300 = vmatprep.subr.mxu1 %v3940_v14 }
0x1133   : > { %3301 = vmatpush3.msra.mxu1 %v3940_v14 }
0x1134   : > { %3302 = vmatprep.subr.mxu1 %v3938_v13 }
0x1135   : > { %3303 = vmatpush3.msra.mxu1 %v3938_v13 }
0x1136   : > { %3304 = vmatprep.subr.mxu1 %v3936_v12 }
0x1137   : > { %3305 = vmatpush3.msra.mxu1 %v3936_v12 }
0x1138   : > { %3306 = vmatprep.subr.mxu1 %v3926_v9 }
0x1139   : > { %3307 = vmatpush3.msra.mxu1 %v3926_v9 }
0x113a   : > { %3308 = vmatprep.subr.mxu1 %v3924_v8 }
0x113b   : > { %3309 = vmatpush3.msra.mxu1 %v3924_v8 }
0x113c   : > { %3310 = vmatprep.subr.mxu1 %v3922_v7 }
0x113d   : > { %3311 = vmatpush3.msra.mxu1 %v3922_v7 }
0x113e   : > { %3312 = vmatprep.subr.mxu1 %v3916_v5 }
0x113f   : > { %3313 = vmatpush3.msra.mxu1 %v3916_v5 }
0x1140   : > { %3314 = vmatprep.subr.mxu1 %v3914_v4 }
0x1141   : > { %3315 = vmatpush3.msra.mxu1 %v3914_v4 }
0x1142   : > { %3378 = vmatprep.subr.mxu1 %v3988_v35 }
0x11e2   : > { %v3280_v59 = vpop.f32.mrf.mxu1 }
0x11e4   : > { %v1443_v60 = vpop.f32.mrf.mxu1 }
0x11e5   : > { %3316 = vmatprep.mubr.f32.mxu1 %v1443_v60 }
0x11e6   : > { %v3283_v51 = vpop.f32.mrf.mxu1  ;;  %3317 = vmatmul.mubr.f32.vlgmr.msra.gmra.mxu1 %v3280_v59 }
0x11e7   : > { %3379 = vmatpush3.msra.mxu1 %v3988_v35 }
0x11e8   : > { %v1453_v61 = vpop.f32.mrf.mxu1  ;;  %3380 = vmatprep.subr.mxu1 %v3986_v34 }
0x11e9   : > { %3319 = vmatprep.mubr.f32.mxu1 %v1453_v61  ;;  %3381 = vmatpush3.msra.mxu1 %v3986_v34 }
0x11ea   : > { %3320 = vmatmul.mubr.f32.gmra.mxu1 %v3283_v51 }
0x11eb   : > { %3390 = vmatprep.mubr.msk.f32.mxu1 %vm109_vm0, %v3906_v0 }
0x12a6   : > { %v3318_v52 = vpop.f32.mrf.mxu1 }
0x12a7   : > { %v1548_v30 = vmax.f32 %v3318_v52, 0.0 }
0x12a8   : > { %v1528_v54 = vpop.f32.mrf.mxu1 }
0x12a9   : > { %v1547_v31 = vmax.f32 %v1528_v54, 0.0 }
0x12aa   : > { %v3321_v56 = vpop.f32.mrf.mxu1 }
0x12ab   : > { %v1550_v62 = vmax.f32 %v3321_v56, 0.0 }
0x12ac   : > { %v1538_v63 = vpop.f32.mrf.mxu1 }
0x12ad   : > { %v1549_v27 = vmax.f32 %v1538_v63, 0.0  ;;  %3326 = vmatprep.subr.mxu0 %v1550_v62 }
0x12ae   : > { %3327 = vmatpush3.msra.mxu0 %v1550_v62 }
0x12af   : > { %3328 = vmatprep.subr.mxu0 %v1549_v27 }
0x12b0   : > { %3329 = vmatpush3.msra.mxu0 %v1549_v27 }
0x12b1   : > { %3330 = vmatprep.subr.mxu0 %v1548_v30 }
0x12b2   : > { %3331 = vmatpush3.msra.mxu0 %v1548_v30 }
0x12b3   : > { %3332 = vmatprep.subr.mxu0 %v1547_v31 }
0x12b4   : > { %3333 = vmatpush3.msra.mxu0 %v1547_v31 }
0x12b5   : > { %3335 = vmatmul.mubr.msk.f32.vlgmr.msra.gmra.mxu0 %vm109_vm0, %v3908_v1  ;;  %3340 = vmatprep.subr.mxu0 %v3972_v26 }
0x12b6   : > { %3337 = vmatprep.mubr.msk.f32.mxu0 %vm109_vm0, %v3910_v2  ;;  %3341 = vmatpush3.msra.mxu0 %v3972_v26 }
0x12b7   : > { %3342 = vmatprep.subr.mxu0 %v3970_v25 }
0x12b8   : > { %3343 = vmatpush3.msra.mxu0 %v3970_v25 }
0x12b9   : > { %3338 = vmatmul.mubr.msk.f32.gmra.mxu0 %vm109_vm0, %v3912_v3  ;;  %3344 = vmatprep.subr.mxu0 %v3964_v23 }
0x12ba   : > { %3345 = vmatpush3.msra.mxu0 %v3964_v23 }
0x12bb   : > { %3346 = vmatprep.subr.mxu0 %v3962_v22 }
0x12bc   : > { %3347 = vmatpush3.msra.mxu0 %v3962_v22 }
0x12bd   : > { %3348 = vmatprep.subr.mxu0 %v3960_v21 }
0x12be   : > { %3349 = vmatpush3.msra.mxu0 %v3960_v21 }
0x12bf   : > { %3350 = vmatprep.subr.mxu0 %v3950_v18 }
0x12c0   : > { %3351 = vmatpush3.msra.mxu0 %v3950_v18 }
0x12c1   : > { %3352 = vmatprep.subr.mxu0 %v3948_v17 }
0x12c2   : > { %3353 = vmatpush3.msra.mxu0 %v3948_v17 }
0x12c3   : > { %3354 = vmatprep.subr.mxu0 %v3946_v16 }
0x12c4   : > { %3355 = vmatpush3.msra.mxu0 %v3946_v16 }
0x12c5   : > { %3356 = vmatprep.subr.mxu0 %v3940_v14 }
0x12c6   : > { %3357 = vmatpush3.msra.mxu0 %v3940_v14 }
0x12c7   : > { %3358 = vmatprep.subr.mxu0 %v3938_v13 }
0x12c8   : > { %3359 = vmatpush3.msra.mxu0 %v3938_v13 }
0x12c9   : > { %3360 = vmatprep.subr.mxu0 %v3936_v12 }
0x12ca   : > { %3361 = vmatpush3.msra.mxu0 %v3936_v12 }
0x12cb   : > { %3362 = vmatprep.subr.mxu0 %v3926_v9 }
0x12cc   : > { %3363 = vmatpush3.msra.mxu0 %v3926_v9 }
0x12cd   : > { %3364 = vmatprep.subr.mxu0 %v3924_v8 }
0x12ce   : > { %3365 = vmatpush3.msra.mxu0 %v3924_v8 }
0x12cf   : > { %3366 = vmatprep.subr.mxu0 %v3922_v7 }
0x12d0   : > { %3367 = vmatpush3.msra.mxu0 %v3922_v7 }
0x12d1   : > { %3368 = vmatprep.subr.mxu0 %v3916_v5 }
0x12d2   : > { %3369 = vmatpush3.msra.mxu0 %v3916_v5 }
0x12d3   : > { %3370 = vmatprep.subr.mxu0 %v3914_v4 }
0x12d4   : > { %3371 = vmatpush3.msra.mxu0 %v3914_v4 }
0x12d5   : > { %3434 = vmatprep.subr.mxu0 %v3988_v35 }
0x1375   : > { %v3336_v32 = vpop.f32.mrf.mxu0 }
0x1377   : > { %v1617_v40 = vpop.f32.mrf.mxu0 }
0x1378   : > { %3372 = vmatprep.mubr.f32.mxu0 %v1617_v40 }
0x1379   : > { %v3339_v41 = vpop.f32.mrf.mxu0  ;;  %3373 = vmatmul.mubr.f32.vlgmr.msra.gmra.mxu0 %v3336_v32 }
0x137a   : > { %3435 = vmatpush3.msra.mxu0 %v3988_v35 }
0x137b   : > { %v1627_v42 = vpop.f32.mrf.mxu0  ;;  %3436 = vmatprep.subr.mxu0 %v3986_v34 }
0x137c   : > { %3375 = vmatprep.mubr.f32.mxu0 %v1627_v42  ;;  %3437 = vmatpush3.msra.mxu0 %v3986_v34 }
0x137d   : > { %3376 = vmatmul.mubr.f32.gmra.mxu0 %v3339_v41 }
0x137e   : > { %3446 = vmatprep.mubr.msk.f32.mxu0 %vm109_vm0, %v3906_v0 }
0x1439   : > { %v3374_v44 = vpop.f32.mrf.mxu0 }
0x143a   : > { %v1722_v19 = vmax.f32 %v3374_v44, 0.0 }
0x143b   : > { %v1702_v45 = vpop.f32.mrf.mxu0 }
0x143c   : > { %v1721_v20 = vmax.f32 %v1702_v45, 0.0 }
0x143d   : > { %v3377_v6 = vpop.f32.mrf.mxu0 }
0x143e   : > { %v1724_v10 = vmax.f32 %v3377_v6, 0.0 }
0x143f   : > { %v1712_v11 = vpop.f32.mrf.mxu0 }
0x1440   : > { %v1723_v15 = vmax.f32 %v1712_v11, 0.0  ;;  %3382 = vmatprep.subr.mxu1 %v1724_v10 }
0x1441   : > { %3383 = vmatpush3.msra.mxu1 %v1724_v10 }
0x1442   : > { %3384 = vmatprep.subr.mxu1 %v1723_v15 }
0x1443   : > { %3385 = vmatpush3.msra.mxu1 %v1723_v15 }
0x1444   : > { %3386 = vmatprep.subr.mxu1 %v1722_v19 }
0x1445   : > { %3387 = vmatpush3.msra.mxu1 %v1722_v19 }
0x1446   : > { %3388 = vmatprep.subr.mxu1 %v1721_v20 }
0x1447   : > { %3389 = vmatpush3.msra.mxu1 %v1721_v20 }
0x1448   : > { %3391 = vmatmul.mubr.msk.f32.vlgmr.msra.gmra.mxu1 %vm109_vm0, %v3908_v1  ;;  %3396 = vmatprep.subr.mxu1 %v3972_v26 }
0x1449   : > { %3393 = vmatprep.mubr.msk.f32.mxu1 %vm109_vm0, %v3910_v2  ;;  %3397 = vmatpush3.msra.mxu1 %v3972_v26 }
0x144a   : > { %3398 = vmatprep.subr.mxu1 %v3970_v25 }
0x144b   : > { %3399 = vmatpush3.msra.mxu1 %v3970_v25 }
0x144c   : > { %3394 = vmatmul.mubr.msk.f32.gmra.mxu1 %vm109_vm0, %v3912_v3  ;;  %3400 = vmatprep.subr.mxu1 %v3964_v23 }
0x144d   : > { %3401 = vmatpush3.msra.mxu1 %v3964_v23 }
0x144e   : > { %3402 = vmatprep.subr.mxu1 %v3962_v22 }
0x144f   : > { %3403 = vmatpush3.msra.mxu1 %v3962_v22 }
0x1450   : > { %3404 = vmatprep.subr.mxu1 %v3960_v21 }
0x1451   : > { %3405 = vmatpush3.msra.mxu1 %v3960_v21 }
0x1452   : > { %3406 = vmatprep.subr.mxu1 %v3950_v18 }
0x1453   : > { %3407 = vmatpush3.msra.mxu1 %v3950_v18 }
0x1454   : > { %3408 = vmatprep.subr.mxu1 %v3948_v17 }
0x1455   : > { %3409 = vmatpush3.msra.mxu1 %v3948_v17 }
0x1456   : > { %3410 = vmatprep.subr.mxu1 %v3946_v16 }
0x1457   : > { %3411 = vmatpush3.msra.mxu1 %v3946_v16 }
0x1458   : > { %3412 = vmatprep.subr.mxu1 %v3940_v14 }
0x1459   : > { %3413 = vmatpush3.msra.mxu1 %v3940_v14 }
0x145a   : > { %3414 = vmatprep.subr.mxu1 %v3938_v13 }
0x145b   : > { %3415 = vmatpush3.msra.mxu1 %v3938_v13 }
0x145c   : > { %3416 = vmatprep.subr.mxu1 %v3936_v12 }
0x145d   : > { %3417 = vmatpush3.msra.mxu1 %v3936_v12 }
0x145e   : > { %3418 = vmatprep.subr.mxu1 %v3926_v9 }
0x145f   : > { %3419 = vmatpush3.msra.mxu1 %v3926_v9 }
0x1460   : > { %3420 = vmatprep.subr.mxu1 %v3924_v8 }
0x1461   : > { %3421 = vmatpush3.msra.mxu1 %v3924_v8 }
0x1462   : > { %3422 = vmatprep.subr.mxu1 %v3922_v7 }
0x1463   : > { %3423 = vmatpush3.msra.mxu1 %v3922_v7 }
0x1464   : > { %3424 = vmatprep.subr.mxu1 %v3916_v5 }
0x1465   : > { %3425 = vmatpush3.msra.mxu1 %v3916_v5 }
0x1466   : > { %3426 = vmatprep.subr.mxu1 %v3914_v4 }
0x1467   : > { %3427 = vmatpush3.msra.mxu1 %v3914_v4 }
0x1468   : > { %3490 = vmatprep.subr.mxu1 %v3988_v35 }
0x1508   : > { %v3392_v24 = vpop.f32.mrf.mxu1 }
0x150a   : > { %v1791_v28 = vpop.f32.mrf.mxu1 }
0x150b   : > { %3428 = vmatprep.mubr.f32.mxu1 %v1791_v28 }
0x150c   : > { %v3395_v29 = vpop.f32.mrf.mxu1  ;;  %3429 = vmatmul.mubr.f32.vlgmr.msra.gmra.mxu1 %v3392_v24 }
0x150d   : > { %3491 = vmatpush3.msra.mxu1 %v3988_v35 }
0x150e   : > { %v1801_v33 = vpop.f32.mrf.mxu1  ;;  %3492 = vmatprep.subr.mxu1 %v3986_v34 }
0x150f   : > { %3431 = vmatprep.mubr.f32.mxu1 %v1801_v33  ;;  %3493 = vmatpush3.msra.mxu1 %v3986_v34 }
0x1510   : > { %3432 = vmatmul.mubr.f32.gmra.mxu1 %v3395_v29 }
0x1511   : > { %3502 = vmatprep.mubr.msk.f32.mxu1 %vm109_vm0, %v3906_v0 }
0x15cc   : > { %v3430_v36 = vpop.f32.mrf.mxu1 }
0x15cd   : > { %v1896_v47 = vmax.f32 %v3430_v36, 0.0 }
0x15ce   : > { %v1876_v37 = vpop.f32.mrf.mxu1 }
0x15cf   : > { %v1895_v48 = vmax.f32 %v1876_v37, 0.0 }
0x15d0   : > { %v3433_v38 = vpop.f32.mrf.mxu1 }
0x15d1   : > { %v1898_v39 = vmax.f32 %v3433_v38, 0.0 }
0x15d2   : > { %v1886_v43 = vpop.f32.mrf.mxu1 }
0x15d3   : > { %v1897_v46 = vmax.f32 %v1886_v43, 0.0  ;;  %3438 = vmatprep.subr.mxu0 %v1898_v39 }
0x15d4   : > { %3439 = vmatpush3.msra.mxu0 %v1898_v39 }
0x15d5   : > { %3440 = vmatprep.subr.mxu0 %v1897_v46 }
0x15d6   : > { %3441 = vmatpush3.msra.mxu0 %v1897_v46 }
0x15d7   : > { %3442 = vmatprep.subr.mxu0 %v1896_v47 }
0x15d8   : > { %3443 = vmatpush3.msra.mxu0 %v1896_v47 }
0x15d9   : > { %3444 = vmatprep.subr.mxu0 %v1895_v48 }
0x15da   : > { %3445 = vmatpush3.msra.mxu0 %v1895_v48 }
0x15db   : > { %3447 = vmatmul.mubr.msk.f32.vlgmr.msra.gmra.mxu0 %vm109_vm0, %v3908_v1  ;;  %3452 = vmatprep.subr.mxu0 %v3972_v26 }
0x15dc   : > { %3449 = vmatprep.mubr.msk.f32.mxu0 %vm109_vm0, %v3910_v2  ;;  %3453 = vmatpush3.msra.mxu0 %v3972_v26 }
0x15dd   : > { %3454 = vmatprep.subr.mxu0 %v3970_v25 }
0x15de   : > { %3455 = vmatpush3.msra.mxu0 %v3970_v25 }
0x15df   : > { %3450 = vmatmul.mubr.msk.f32.gmra.mxu0 %vm109_vm0, %v3912_v3  ;;  %3456 = vmatprep.subr.mxu0 %v3964_v23 }
0x15e0   : > { %3457 = vmatpush3.msra.mxu0 %v3964_v23 }
0x15e1   : > { %3458 = vmatprep.subr.mxu0 %v3962_v22 }
0x15e2   : > { %3459 = vmatpush3.msra.mxu0 %v3962_v22 }
0x15e3   : > { %3460 = vmatprep.subr.mxu0 %v3960_v21 }
0x15e4   : > { %3461 = vmatpush3.msra.mxu0 %v3960_v21 }
0x15e5   : > { %3462 = vmatprep.subr.mxu0 %v3950_v18 }
0x15e6   : > { %3463 = vmatpush3.msra.mxu0 %v3950_v18 }
0x15e7   : > { %3464 = vmatprep.subr.mxu0 %v3948_v17 }
0x15e8   : > { %3465 = vmatpush3.msra.mxu0 %v3948_v17 }
0x15e9   : > { %3466 = vmatprep.subr.mxu0 %v3946_v16 }
0x15ea   : > { %3467 = vmatpush3.msra.mxu0 %v3946_v16 }
0x15eb   : > { %3468 = vmatprep.subr.mxu0 %v3940_v14 }
0x15ec   : > { %3469 = vmatpush3.msra.mxu0 %v3940_v14 }
0x15ed   : > { %3470 = vmatprep.subr.mxu0 %v3938_v13 }
0x15ee   : > { %3471 = vmatpush3.msra.mxu0 %v3938_v13 }
0x15ef   : > { %3472 = vmatprep.subr.mxu0 %v3936_v12 }
0x15f0   : > { %3473 = vmatpush3.msra.mxu0 %v3936_v12 }
0x15f1   : > { %3474 = vmatprep.subr.mxu0 %v3926_v9 }
0x15f2   : > { %3475 = vmatpush3.msra.mxu0 %v3926_v9 }
0x15f3   : > { %3476 = vmatprep.subr.mxu0 %v3924_v8 }
0x15f4   : > { %3477 = vmatpush3.msra.mxu0 %v3924_v8 }
0x15f5   : > { %3478 = vmatprep.subr.mxu0 %v3922_v7 }
0x15f6   : > { %3479 = vmatpush3.msra.mxu0 %v3922_v7 }
0x15f7   : > { %3480 = vmatprep.subr.mxu0 %v3916_v5 }
0x15f8   : > { %3481 = vmatpush3.msra.mxu0 %v3916_v5 }
0x15f9   : > { %3482 = vmatprep.subr.mxu0 %v3914_v4 }
0x15fa   : > { %3483 = vmatpush3.msra.mxu0 %v3914_v4 }
0x15fb   : > { %3546 = vmatprep.subr.mxu0 %v3988_v35 }
0x169b   : > { %v3448_v49 = vpop.f32.mrf.mxu0 }
0x169d   : > { %v1965_v50 = vpop.f32.mrf.mxu0 }
0x169e   : > { %3484 = vmatprep.mubr.f32.mxu0 %v1965_v50 }
0x169f   : > { %v3451_v53 = vpop.f32.mrf.mxu0  ;;  %3485 = vmatmul.mubr.f32.vlgmr.msra.gmra.mxu0 %v3448_v49 }
0x16a0   : > { %3547 = vmatpush3.msra.mxu0 %v3988_v35 }
0x16a1   : > { %v1975_v55 = vpop.f32.mrf.mxu0  ;;  %3548 = vmatprep.subr.mxu0 %v3986_v34 }
0x16a2   : > { %3487 = vmatprep.mubr.f32.mxu0 %v1975_v55  ;;  %3549 = vmatpush3.msra.mxu0 %v3986_v34 }
0x16a3   : > { %3488 = vmatmul.mubr.f32.gmra.mxu0 %v3451_v53 }
0x16a4   : > { %3558 = vmatprep.mubr.msk.f32.mxu0 %vm109_vm0, %v3906_v0 }
0x175f   : > { %v3486_v57 = vpop.f32.mrf.mxu0 }
0x1760   : > { %v2070_v52 = vmax.f32 %v3486_v57, 0.0 }
0x1761   : > { %v2050_v58 = vpop.f32.mrf.mxu0 }
0x1762   : > { %v2069_v54 = vmax.f32 %v2050_v58, 0.0 }
0x1763   : > { %v3489_v59 = vpop.f32.mrf.mxu0 }
0x1764   : > { %v2072_v60 = vmax.f32 %v3489_v59, 0.0 }
0x1765   : > { %v2060_v51 = vpop.f32.mrf.mxu0 }
0x1766   : > { %v2071_v61 = vmax.f32 %v2060_v51, 0.0  ;;  %3494 = vmatprep.subr.mxu1 %v2072_v60 }
0x1767   : > { %3495 = vmatpush3.msra.mxu1 %v2072_v60 }
0x1768   : > { %3496 = vmatprep.subr.mxu1 %v2071_v61 }
0x1769   : > { %3497 = vmatpush3.msra.mxu1 %v2071_v61 }
0x176a   : > { %3498 = vmatprep.subr.mxu1 %v2070_v52 }
0x176b   : > { %3499 = vmatpush3.msra.mxu1 %v2070_v52 }
0x176c   : > { %3500 = vmatprep.subr.mxu1 %v2069_v54 }
0x176d   : > { %3501 = vmatpush3.msra.mxu1 %v2069_v54 }
0x176e   : > { %3503 = vmatmul.mubr.msk.f32.vlgmr.msra.gmra.mxu1 %vm109_vm0, %v3908_v1  ;;  %3508 = vmatprep.subr.mxu1 %v3972_v26 }
0x176f   : > { %3505 = vmatprep.mubr.msk.f32.mxu1 %vm109_vm0, %v3910_v2  ;;  %3509 = vmatpush3.msra.mxu1 %v3972_v26 }
0x1770   : > { %3510 = vmatprep.subr.mxu1 %v3970_v25 }
0x1771   : > { %3511 = vmatpush3.msra.mxu1 %v3970_v25 }
0x1772   : > { %3506 = vmatmul.mubr.msk.f32.gmra.mxu1 %vm109_vm0, %v3912_v3  ;;  %3512 = vmatprep.subr.mxu1 %v3964_v23 }
0x1773   : > { %3513 = vmatpush3.msra.mxu1 %v3964_v23 }
0x1774   : > { %3514 = vmatprep.subr.mxu1 %v3962_v22 }
0x1775   : > { %3515 = vmatpush3.msra.mxu1 %v3962_v22 }
0x1776   : > { %3516 = vmatprep.subr.mxu1 %v3960_v21 }
0x1777   : > { %3517 = vmatpush3.msra.mxu1 %v3960_v21 }
0x1778   : > { %3518 = vmatprep.subr.mxu1 %v3950_v18 }
0x1779   : > { %3519 = vmatpush3.msra.mxu1 %v3950_v18 }
0x177a   : > { %3520 = vmatprep.subr.mxu1 %v3948_v17 }
0x177b   : > { %3521 = vmatpush3.msra.mxu1 %v3948_v17 }
0x177c   : > { %3522 = vmatprep.subr.mxu1 %v3946_v16 }
0x177d   : > { %3523 = vmatpush3.msra.mxu1 %v3946_v16 }
0x177e   : > { %3524 = vmatprep.subr.mxu1 %v3940_v14 }
0x177f   : > { %3525 = vmatpush3.msra.mxu1 %v3940_v14 }
0x1780   : > { %3526 = vmatprep.subr.mxu1 %v3938_v13 }
0x1781   : > { %3527 = vmatpush3.msra.mxu1 %v3938_v13 }
0x1782   : > { %3528 = vmatprep.subr.mxu1 %v3936_v12 }
0x1783   : > { %3529 = vmatpush3.msra.mxu1 %v3936_v12 }
0x1784   : > { %3530 = vmatprep.subr.mxu1 %v3926_v9 }
0x1785   : > { %3531 = vmatpush3.msra.mxu1 %v3926_v9 }
0x1786   : > { %3532 = vmatprep.subr.mxu1 %v3924_v8 }
0x1787   : > { %3533 = vmatpush3.msra.mxu1 %v3924_v8 }
0x1788   : > { %3534 = vmatprep.subr.mxu1 %v3922_v7 }
0x1789   : > { %3535 = vmatpush3.msra.mxu1 %v3922_v7 }
0x178a   : > { %3536 = vmatprep.subr.mxu1 %v3916_v5 }
0x178b   : > { %3537 = vmatpush3.msra.mxu1 %v3916_v5 }
0x178c   : > { %3538 = vmatprep.subr.mxu1 %v3914_v4 }
0x178d   : > { %3539 = vmatpush3.msra.mxu1 %v3914_v4 }
0x182e   : > { %v3504_v56 = vpop.f32.mrf.mxu1 }
0x1830   : > { %v2139_v62 = vpop.f32.mrf.mxu1 }
0x1831   : > { %3540 = vmatprep.mubr.f32.mxu1 %v2139_v62 }
0x1832   : > { %v3507_v63 = vpop.f32.mrf.mxu1  ;;  %3541 = vmatmul.mubr.f32.vlgmr.msra.gmra.mxu1 %v3504_v56 }
0x1834   : > { %v2149_v27 = vpop.f32.mrf.mxu1 }
0x1835   : > { %3543 = vmatprep.mubr.f32.mxu1 %v2149_v27 }
0x1836   : > { %3544 = vmatmul.mubr.f32.gmra.mxu1 %v3507_v63 }
0x18f2   : > { %v3542_v30 = vpop.f32.mrf.mxu1 }
0x18f3   : > { %v4539_v44 = vmax.f32 %v3542_v30, 0.0 }
0x18f4   : > { %v2224_v31 = vpop.f32.mrf.mxu1 }
0x18f5   : > { %v2243_v45 = vmax.f32 %v2224_v31, 0.0 }
0x18f6   : > { %v3545_v32 = vpop.f32.mrf.mxu1 }
0x18f7   : > { %v4533_v40 = vmax.f32 %v3545_v32, 0.0 }
0x18f8   : > { %v2234_v41 = vpop.f32.mrf.mxu1 }
0x18f9   : > { %v4535_v42 = vmax.f32 %v2234_v41, 0.0  ;;  %3550 = vmatprep.subr.mxu0 %v4533_v40 }
0x18fa   : > { %3551 = vmatpush3.msra.mxu0 %v4533_v40 }
0x18fb   : > { %3552 = vmatprep.subr.mxu0 %v4535_v42 }
0x18fc   : > { %3553 = vmatpush3.msra.mxu0 %v4535_v42 }
0x18fd   : > { %3554 = vmatprep.subr.mxu0 %v4539_v44 }
0x18fe   : > { %3555 = vmatpush3.msra.mxu0 %v4539_v44 }
0x18ff   : > { %3556 = vmatprep.subr.mxu0 %v2243_v45 }
0x1900   : > { %3557 = vmatpush3.msra.mxu0 %v2243_v45 }
0x1901   : > { %3559 = vmatmul.mubr.msk.f32.vlgmr.msra.gmra.mxu0 %vm109_vm0, %v3908_v1  ;;  %3564 = vmatprep.subr.mxu0 %v3972_v26 }
0x1902   : > { %3561 = vmatprep.mubr.msk.f32.mxu0 %vm109_vm0, %v3910_v2  ;;  %3565 = vmatpush3.msra.mxu0 %v3972_v26 }
0x1903   : > { %3566 = vmatprep.subr.mxu0 %v3970_v25 }
0x1904   : > { %3567 = vmatpush3.msra.mxu0 %v3970_v25 }
0x1905   : > { %3562 = vmatmul.mubr.msk.f32.gmra.mxu0 %vm109_vm0, %v3912_v3  ;;  %3568 = vmatprep.subr.mxu0 %v3964_v23 }
0x1906   : > { %3569 = vmatpush3.msra.mxu0 %v3964_v23 }
0x1907   : > { %3570 = vmatprep.subr.mxu0 %v3962_v22 }
0x1908   : > { %3571 = vmatpush3.msra.mxu0 %v3962_v22 }
0x1909   : > { %3572 = vmatprep.subr.mxu0 %v3960_v21 }
0x190a   : > { %3573 = vmatpush3.msra.mxu0 %v3960_v21 }
0x190b   : > { %3574 = vmatprep.subr.mxu0 %v3950_v18 }
0x190c   : > { %3575 = vmatpush3.msra.mxu0 %v3950_v18 }
0x190d   : > { %3576 = vmatprep.subr.mxu0 %v3948_v17 }
0x190e   : > { %3577 = vmatpush3.msra.mxu0 %v3948_v17 }
0x190f   : > { %3578 = vmatprep.subr.mxu0 %v3946_v16 }
0x1910   : > { %3579 = vmatpush3.msra.mxu0 %v3946_v16 }
0x1911   : > { %3580 = vmatprep.subr.mxu0 %v3940_v14 }
0x1912   : > { %3581 = vmatpush3.msra.mxu0 %v3940_v14 }
0x1913   : > { %3582 = vmatprep.subr.mxu0 %v3938_v13 }
0x1914   : > { %3583 = vmatpush3.msra.mxu0 %v3938_v13 }
0x1915   : > { %3584 = vmatprep.subr.mxu0 %v3936_v12 }
0x1916   : > { %3585 = vmatpush3.msra.mxu0 %v3936_v12 }
0x1917   : > { %3586 = vmatprep.subr.mxu0 %v3926_v9 }
0x1918   : > { %3587 = vmatpush3.msra.mxu0 %v3926_v9 }
0x1919   : > { %3588 = vmatprep.subr.mxu0 %v3924_v8 }
0x191a   : > { %3589 = vmatpush3.msra.mxu0 %v3924_v8 }
0x191b   : > { %3590 = vmatprep.subr.mxu0 %v3922_v7 }
0x191c   : > { %3591 = vmatpush3.msra.mxu0 %v3922_v7 }
0x191d   : > { %3592 = vmatprep.subr.mxu0 %v3916_v5 }
0x191e   : > { %3593 = vmatpush3.msra.mxu0 %v3916_v5 }
0x191f   : > { %3594 = vmatprep.subr.mxu0 %v3914_v4 }
0x1920   : > { %3595 = vmatpush3.msra.mxu0 %v3914_v4 }
0x19c1   : > { %v3560_v6 = vpop.f32.mrf.mxu0 }
0x19c3   : > { %v2313_v10 = vpop.f32.mrf.mxu0 }
0x19c4   : > { %3596 = vmatprep.mubr.f32.mxu0 %v2313_v10 }
0x19c5   : > { %v3563_v11 = vpop.f32.mrf.mxu0  ;;  %3597 = vmatmul.mubr.f32.vlgmr.msra.gmra.mxu0 %v3560_v6 }
0x19c7   : > { %v2323_v15 = vpop.f32.mrf.mxu0 }
0x19c8   : > { %3599 = vmatprep.mubr.f32.mxu0 %v2323_v15 }
0x19c9   : > { %3600 = vmatmul.mubr.f32.gmra.mxu0 %v3563_v11 }
0x1a85   : > { %v3598_v19 = vpop.f32.mrf.mxu0 }
0x1a86   : > { %v2418_v24 = vmax.f32 %v3598_v19, 0.0  }
0x1a87   : > { %v2398_v20 = vpop.f32.mrf.mxu0 }
0x1a88   : > { %v2417_v28 = vmax.f32 %v2398_v20, 0.0   ;;  %v2422_v38 = vsub.f32 %v2418_v24, %v4539_v44 }
0x1a89   : > { %v3601_v29 = vpop.f32.mrf.mxu0 }
0x1a8a   : > { %v2421_v33 = vsub.f32 %v2417_v28, %v2243_v45  ;;  %v2420_v36 = vmax.f32 %v3601_v29, 0.0   ;;  %v2426_v48 = vand.u32 2147483647, %v2422_v38  ;;  %v4615_v38 = vmov %v2417_v28 }
0x1a8b   : > { %v2408_v37 = vpop.f32.mrf.mxu0 }
0x1a8c   : > { %v2424_v39 = vsub.f32 %v2420_v36, %v4533_v40  ;;  %v2419_v46 = vmax.f32 %v2408_v37, 0.0   ;;  %v2425_v43 = vand.u32 2147483647, %v2421_v33 }
0x1a8e   : > { %v2423_v47 = vsub.f32 %v2419_v46, %v4535_v42  ;;  %v2428_v49 = vand.u32 2147483647, %v2424_v39  ;;  %v2429_v53 = vmax.f32.f32 %v2425_v43, %v2426_v48  ;;  %v4612_v39 = vmov %v2420_v36 }
0x1a8f   : > { %v4613_v37 = vmov %v2419_v46  ;;  %v4614_v43 = vmov %v2418_v24 }
0x1a90   : > { %v2427_v50 = vand.u32 2147483647, %v2423_v47 }
0x1a92   : > { %v2430_v55 = vmax.f32.f32 %v2427_v50, %v2428_v49 }
0x1a94   : > { %v2431_v57 = vmax.f32.f32 %v2429_v53, %v2430_v55 }
0x1a96   : > { %2432 = vmax.xlane.f32.xlu0 %v2431_v57 }
0x1b1f   : > { %v2433_v58 = vpop.xlane.xlu0 %2432 }
0x1b20   : > { %v2434_v59 = vrot.slane %v2433_v58, 4 }
0x1b22   : > { %v2435_v60 = vmax.f32 %v2433_v58, %v2434_v59 }
0x1b24   : > { %v2436_v51 = vrot.slane %v2435_v60, 2 }
0x1b26   : > { %v2437_v61 = vmax.f32 %v2435_v60, %v2436_v51 }
0x1b28   : > { %v2438_v52 = vrot.slane %v2437_v61, 1 }
0x1b2a   : > { %v2439_v54 = vmax.f32 %v2437_v61, %v2438_v52 }
0x1b2c   : > { %3606 = vpush %v2439_v54 }
0x1b5d   : > { %s3607_s8 = spop %3606 }
0x1b5e   : > { %p2441_p5 = scmp.lt.f32.partialorder %s3607_s8, 3e-06 }
0x1b60   : > { %s2442_s9 = scalar_select %p2441_p5, 1, 0 }
0x1b62   : > { %p1011_p7 = scmp.eq.s32.totalorder %s2442_s9, 0 }
0x1b64   : > { %p1012_p8 = pnand %p1011_p7, %p1010_p6 }
0x1b65   :  { %2444 = vst [vmem:[#allocation8] sm:$0xff] (%p1012_p8), %v2417_v28  ;;  %2445 = vst [vmem:[#allocation8 + $0x8] sm:$0xff] (%p1012_p8), %v2418_v24  ;;  %s3867_s10 = smov (%p1012_p8), [#allocation8]  }
0x1b66   :  { %1015 = sbr.rel (!%p1012_p8) target bundleno = 3568 (0xdf0), region = 69  ;;  %2446 = vst [vmem:[#allocation8 + $0x10] sm:$0xff] (%p1012_p8), %v2419_v46  ;;  %2447 = vst [vmem:[#allocation8 + $0x18] sm:$0xff] (%p1012_p8), %v2420_v36  ;;  %s2453_s11 = sshll.u32 (%p1012_p8), %s3867_s10, 4  ;;  %s2454_s11 = int_to_ptr.vmem [resolvable:$true] %s2453_s11 }
0x1b67   :  { %s3755_s12 = scalar_lea.vmem (%p1012_p8), %s2454_s11, 512  ;;  %p3760_p10 = scmp.lt.s32.totalorder (%p1012_p8), %s2454_s11, %s2454_s11 }
0x1b68   :  { %p3756_p9 = scmp.ne.s32.totalorder (%p1012_p8), %s2454_s11, %s3755_s12  ;;  %p3761_p11 = scmp.lt.s32.totalorder (%p1012_p8), %s3755_s12, %s3755_s12 }
0x1b6a   :  { %p3762_p12 = por (%p1012_p8), %p3761_p11, %p3760_p10 }
0x1b6c   :  { %p3763_p13 = pnand %p3762_p12, %p3756_p9 }
0x1b6e   :  { %3766 = shalt.err (!%p3763_p13)
}
0x1b6f   :  { %2459 = dma.vmem_to_hbm [thread:$0]  %s2454_s11, 512, %s4606_s3, [#allocation4], %s3863_s17, %s3863_s17, %s3864_s18  }
0x1b70   :  { %3819 = dma.done.wait [#allocation4], 512  }
0x1b71   :  { %3820 = vsyncadd [#allocation4], 4294966784 }
0x1b72   :  { %2463 = vsyncpa [#allocation3], 1 }
0x1b73   :  { %2464 = vsyncpa [#allocation6], 1 }
0x1b74   :  { %2465 = vsyncpa [#allocation4], 1 }

</bundles_post_ra>
